<compile_context>
chip_gen: v6e
topology: v6e:2x2x1
jax: 0.10.0
libtpu: 0.0.40
codegen_flags: <defaults>
</compile_context>

<pallas_src>
import functools
import math

import jax
import jax.numpy as jnp
from jax.experimental import pallas as pl
from jax.experimental.pallas import tpu as pltpu

# ----------------------------- config (small, synthetic) -----------------------------
CFG = dict(
    vocab_size=100,
    max_position=64,
    type_vocab_size=2,
    hidden_size=32,
    num_layers=2,
    num_heads=4,
    intermediate_size=64,
    kernel_size=3,          # CNN kernel size (odd -> 'same' padding)
    layer_norm_eps=1e-12,
)

_VMEM = pl.BlockSpec(memory_space=pltpu.MemorySpace.VMEM)


# ----------------------------- in-kernel helpers (pure, f32) -----------------------------
def _ln(x, g, b, eps):
    mu = jnp.mean(x, axis=-1, keepdims=True)
    var = jnp.mean((x - mu) ** 2, axis=-1, keepdims=True)
    return (x - mu) * jax.lax.rsqrt(var + eps) * g + b


def _gelu_exact(x):
    # exact (erf-based) GELU, matching BERT's "gelu"; 1/sqrt(2) as a Python literal
    return 0.5 * x * (1.0 + jax.lax.erf(x * 0.7071067811865475))


# ----------------------------- Pallas kernels -----------------------------
def _embed_layernorm_kernel(eps, x_ref, g_ref, b_ref, o_ref):
    x = x_ref[...].astype(jnp.float32)
    o_ref[...] = _ln(x, g_ref[...], b_ref[...], eps).astype(o_ref.dtype)


def _encoder_layer_kernel(B, S, nh, dh, eps, scale,
                          x_ref, wqkv_ref, bqkv_ref, wo_ref, bo_ref,
                          ln1_g_ref, ln1_b_ref, w1_ref, b1_ref,
                          w2_ref, b2_ref, ln2_g_ref, ln2_b_ref, o_ref):
    """One full BERT encoder layer, fully VMEM-resident."""
    H = nh * dh
    x = x_ref[...].astype(jnp.float32)                                   # (B*S, H)

    # --- fused Q/K/V projection: (B*S, H) @ (H, 3H), bf16 MXU, f32 acc ---
    qkv = jnp.dot(x.astype(jnp.bfloat16),
                  wqkv_ref[...].astype(jnp.bfloat16),
                  preferred_element_type=jnp.float32) + bqkv_ref[...]

    # --- per-head attention (static unroll; everything stays in vregs) ---
    ctx_heads = []
    for h in range(nh):
        qh = qkv[:, h * dh:(h + 1) * dh].reshape(B, S, dh).astype(jnp.bfloat16)
        kh = qkv[:, H + h * dh:H + (h + 1) * dh].reshape(B, S, dh).astype(jnp.bfloat16)
        vh = qkv[:, 2 * H + h * dh:2 * H + (h + 1) * dh].reshape(B, S, dh).astype(jnp.bfloat16)
        s = jnp.einsum('bqd,bkd->bqk', qh, kh,
                       preferred_element_type=jnp.float32) * scale
        # TODO(synk): no attention padding mask (synthetic all-valid input).
        m = jnp.max(s, axis=-1, keepdims=True)
        p = jnp.exp(s - m)
        p = p * pl.reciprocal(jnp.sum(p, axis=-1, keepdims=True), approx=True)
        ctx = jnp.einsum('bqk,bkd->bqd', p.astype(jnp.bfloat16), vh,
                         preferred_element_type=jnp.float32)
        ctx_heads.append(ctx.reshape(B * S, dh))
    ctx = jnp.concatenate(ctx_heads, axis=-1)                            # (B*S, H)

    # --- attention output projection + residual + LayerNorm epilogue ---
    attn_out = jnp.dot(ctx.astype(jnp.bfloat16),
                       wo_ref[...].astype(jnp.bfloat16),
                       preferred_element_type=jnp.float32) + bo_ref[...]
    h1 = _ln(attn_out + x, ln1_g_ref[...], ln1_b_ref[...], eps)

    # --- FFN (GELU) + residual + LayerNorm epilogue ---
    ffn = jnp.dot(h1.astype(jnp.bfloat16),
                  w1_ref[...].astype(jnp.bfloat16),
                  preferred_element_type=jnp.float32) + b1_ref[...]
    ffn = _gelu_exact(ffn)
    ffn2 = jnp.dot(ffn.astype(jnp.bfloat16),
                   w2_ref[...].astype(jnp.bfloat16),
                   preferred_element_type=jnp.float32) + b2_ref[...]
    o_ref[...] = _ln(ffn2 + h1, ln2_g_ref[...], ln2_b_ref[...], eps).astype(o_ref.dtype)


def _conv1d_im2col_kernel(K, S, xp_ref, w_ref, o_ref):
    # xp: (B, S+K-1, H_in) zero-padded, w: (K*H_in, H_out), out: (B, S, H_out)
    B, _, H_out = o_ref.shape
    H_in = xp_ref.shape[2]
    xp = xp_ref[...].astype(jnp.float32)
    cols = [xp[:, dk:dk + S, :].reshape(B * S, H_in) for dk in range(K)]
    x2d = jnp.concatenate(cols, axis=-1).astype(jnp.bfloat16)            # (B*S, K*H_in)
    out = jnp.dot(x2d, w_ref[...].astype(jnp.bfloat16),
                  preferred_element_type=jnp.float32)
    o_ref[...] = out.reshape(B, S, H_out).astype(o_ref.dtype)


# ----------------------------- wrappers -----------------------------
def pallas_embed_layernorm(x2d, gamma, beta, eps):
    M, H = x2d.shape
    return pl.pallas_call(
        functools.partial(_embed_layernorm_kernel, float(eps)),
        out_shape=jax.ShapeDtypeStruct((M, H), x2d.dtype),
        in_specs=[_VMEM, _VMEM, _VMEM],
        out_specs=_VMEM,
    )(x2d, gamma.reshape(1, H), beta.reshape(1, H))


def pallas_encoder_layer(x2d, lyr, B, S, nh, dh, eps):
    H = nh * dh
    I = lyr['w1'].shape[1]
    scale = 1.0 / math.sqrt(dh)
    kern = functools.partial(_encoder_layer_kernel, B, S, nh, dh, float(eps), float(scale))
    return pl.pallas_call(
        kern,
        out_shape=jax.ShapeDtypeStruct((B * S, H), x2d.dtype),
        in_specs=[_VMEM] * 13,
        out_specs=_VMEM,
    )(x2d,
      lyr['wqkv'], lyr['bqkv'].reshape(1, 3 * H),
      lyr['wo'], lyr['bo'].reshape(1, H),
      lyr['attn_ln_g'].reshape(1, H), lyr['attn_ln_b'].reshape(1, H),
      lyr['w1'], lyr['b1'].reshape(1, I),
      lyr['w2'], lyr['b2'].reshape(1, H),
      lyr['out_ln_g'].reshape(1, H), lyr['out_ln_b'].reshape(1, H))


def pallas_conv1d_same(x_bsh, conv_w):
    # x: (B, S, H_in);  conv_w: (H_out, H_in, K)  (PyTorch Conv1d layout), bias=False
    B, S, H_in = x_bsh.shape
    H_out, _, K = conv_w.shape
    pad = (K - 1) // 2
    xp = jnp.pad(x_bsh, ((0, 0), (pad, pad), (0, 0)))                    # (B, S+K-1, H_in)
    w_flat = jnp.transpose(conv_w, (2, 1, 0)).reshape(K * H_in, H_out)   # (K*H_in, H_out)
    return pl.pallas_call(
        functools.partial(_conv1d_im2col_kernel, K, S),
        out_shape=jax.ShapeDtypeStruct((B, S, H_out), x_bsh.dtype),
        in_specs=[_VMEM, _VMEM],
        out_specs=_VMEM,
    )(xp, w_flat)


# ----------------------------- parameter init (deterministic, synthetic) -----------------------------
def init_params(key, cfg):
    H = cfg['hidden_size']
    I = cfg['intermediate_size']
    L = cfg['num_layers']
    K = cfg['kernel_size']

    keys = iter(jax.random.split(key, 128))

    def nrm(shape, std=0.02):
        return jax.random.normal(next(keys), shape, jnp.float32) * std

    p = dict(
        word_emb=nrm((cfg['vocab_size'], H)),
        pos_emb=nrm((cfg['max_position'], H)),
        type_emb=nrm((cfg['type_vocab_size'], H)),
        emb_ln_g=jnp.ones((H,), jnp.float32),
        emb_ln_b=jnp.zeros((H,), jnp.float32),
        layers=[],
        conv_w=nrm((H, H, K), std=1.0 / math.sqrt(H * K)),  # Conv1d(H, H, K, bias=False)
    )
    for _ in range(L):
        wq, wk, wv = nrm((H, H)), nrm((H, H)), nrm((H, H))
        p['layers'].append(dict(
            wqkv=jnp.concatenate([wq, wk, wv], axis=1),          # (H, 3H) packed QKV
            bqkv=jnp.zeros((3 * H,), jnp.float32),
            wo=nrm((H, H)), bo=jnp.zeros((H,), jnp.float32),
            attn_ln_g=jnp.ones((H,), jnp.float32), attn_ln_b=jnp.zeros((H,), jnp.float32),
            w1=nrm((H, I)), b1=jnp.zeros((I,), jnp.float32),
            w2=nrm((I, H)), b2=jnp.zeros((H,), jnp.float32),
            out_ln_g=jnp.ones((H,), jnp.float32), out_ln_b=jnp.zeros((H,), jnp.float32),
        ))
    return p


# ----------------------------- BertCNN forward -----------------------------
def bert_cnn_forward(params, token_ids, cfg):
    B, S = token_ids.shape
    H = cfg['hidden_size']
    nh = cfg['num_heads']
    dh = H // nh
    eps = cfg['layer_norm_eps']

    # --- BERT embeddings (gathers = glue), token_type id fixed at 0 ---
    h = (params['word_emb'][token_ids]
         + params['pos_emb'][:S][None, :, :]
         + params['type_emb'][0][None, None, :])
    h2d = pallas_embed_layernorm(h.reshape(B * S, H),
                                 params['emb_ln_g'], params['emb_ln_b'], eps)
    # TODO(synk): dropout omitted (identity in eval mode).

    # --- BERT encoder layers: one fused pallas_call per layer ---
    for lyr in params['layers']:
        h2d = pallas_encoder_layer(h2d, lyr, B, S, nh, dh, eps)

    # --- CNN head: Conv1d(H, H, K, bias=False, padding='same') over sequence dim ---
    out = pallas_conv1d_same(h2d.reshape(B, S, H), params['conv_w'])
    return out  # (B, S, H)


# ----------------------------- main -----------------------------
if __name__ == "__main__":
    key = jax.random.PRNGKey(0)
    pkey, xkey = jax.random.split(key)

    params = init_params(pkey, CFG)

    B, S = 2, 8
    token_ids = jax.random.randint(xkey, (B, S), 0, CFG['vocab_size'], dtype=jnp.int32)

    fwd = jax.jit(functools.partial(bert_cnn_forward, cfg=CFG))
    out = fwd(params, token_ids)
    out = jax.block_until_ready(out)

    assert out.shape == (B, S, CFG['hidden_size'])
    assert jnp.all(jnp.isfinite(out))
    print("KERNEL_OK")
</pallas_src>

<mosaic_0001>
module attributes {stable_mosaic.version = 11 : i64} {
  func.func @_embed_layernorm_kernel(%arg0: memref<16x32xf32, #tpu.memory_space<vmem>>, %arg1: memref<1x32xf32, #tpu.memory_space<vmem>>, %arg2: memref<1x32xf32, #tpu.memory_space<vmem>>, %arg3: memref<16x32xf32, #tpu.memory_space<vmem>>) attributes {dimension_semantics = [], scalar_prefetch = 0 : i64, scratch_operands = 0 : i64, tpu.core_type = #tpu.core_type<tc>} {
    %c0 = arith.constant 0 : index
    %c0_0 = arith.constant 0 : index
    %0 = vector.load %arg0[%c0, %c0_0] : memref<16x32xf32, #tpu.memory_space<vmem>>, vector<16x32xf32>
    %c0_1 = arith.constant 0 : index
    %c0_2 = arith.constant 0 : index
    %1 = vector.load %arg1[%c0_1, %c0_2] : memref<1x32xf32, #tpu.memory_space<vmem>>, vector<1x32xf32>
    %c0_3 = arith.constant 0 : index
    %c0_4 = arith.constant 0 : index
    %2 = vector.load %arg2[%c0_3, %c0_4] : memref<1x32xf32, #tpu.memory_space<vmem>>, vector<1x32xf32>
    %cst = arith.constant dense<0.000000e+00> : vector<16xf32>
    %3 = vector.multi_reduction <add>, %0, %cst [1] : vector<16x32xf32> to vector<16xf32>
    %4 = vector.shape_cast %3 : vector<16xf32> to vector<16x1xf32>
    %cst_5 = arith.constant 3.200000e+01 : f32
    %5 = vector.broadcast %cst_5 : f32 to vector<16x1xf32>
    %6 = arith.divf %4, %5 : vector<16x1xf32>
    %7 = vector.broadcast %6 : vector<16x1xf32> to vector<16x32xf32>
    %8 = arith.subf %0, %7 : vector<16x32xf32>
    %9 = arith.mulf %8, %8 : vector<16x32xf32>
    %cst_6 = arith.constant dense<0.000000e+00> : vector<16xf32>
    %10 = vector.multi_reduction <add>, %9, %cst_6 [1] : vector<16x32xf32> to vector<16xf32>
    %11 = vector.shape_cast %10 : vector<16xf32> to vector<16x1xf32>
    %cst_7 = arith.constant 3.200000e+01 : f32
    %12 = vector.broadcast %cst_7 : f32 to vector<16x1xf32>
    %13 = arith.divf %11, %12 : vector<16x1xf32>
    %14 = vector.broadcast %6 : vector<16x1xf32> to vector<16x32xf32>
    %15 = arith.subf %0, %14 : vector<16x32xf32>
    %cst_8 = arith.constant 9.99999996E-13 : f32
    %16 = vector.broadcast %cst_8 : f32 to vector<16x1xf32>
    %17 = arith.addf %13, %16 : vector<16x1xf32>
    %18 = math.rsqrt %17 : vector<16x1xf32>
    %19 = vector.broadcast %18 : vector<16x1xf32> to vector<16x32xf32>
    %20 = arith.mulf %15, %19 : vector<16x32xf32>
    %21 = vector.broadcast %1 : vector<1x32xf32> to vector<16x32xf32>
    %22 = arith.mulf %20, %21 : vector<16x32xf32>
    %23 = vector.broadcast %2 : vector<1x32xf32> to vector<16x32xf32>
    %24 = arith.addf %22, %23 : vector<16x32xf32>
    %c0_9 = arith.constant 0 : index
    %c0_10 = arith.constant 0 : index
    %25 = vector.load %arg3[%c0_9, %c0_10] : memref<16x32xf32, #tpu.memory_space<vmem>>, vector<16x32xf32>
    tpu.vector_store %arg3[%c0_9, %c0_10], %24 {strides = array<i32>} : memref<16x32xf32, #tpu.memory_space<vmem>>, vector<16x32xf32>,
    return
  }
}

module attributes {stable_mosaic.version = 11 : i64} {
  func.func @_encoder_layer_kernel(%arg0: memref<16x32xf32, #tpu.memory_space<vmem>>, %arg1: memref<32x96xf32, #tpu.memory_space<vmem>>, %arg2: memref<1x96xf32, #tpu.memory_space<vmem>>, %arg3: memref<32x32xf32, #tpu.memory_space<vmem>>, %arg4: memref<1x32xf32, #tpu.memory_space<vmem>>, %arg5: memref<1x32xf32, #tpu.memory_space<vmem>>, %arg6: memref<1x32xf32, #tpu.memory_space<vmem>>, %arg7: memref<32x64xf32, #tpu.memory_space<vmem>>, %arg8: memref<1x64xf32, #tpu.memory_space<vmem>>, %arg9: memref<64x32xf32, #tpu.memory_space<vmem>>, %arg10: memref<1x32xf32, #tpu.memory_space<vmem>>, %arg11: memref<1x32xf32, #tpu.memory_space<vmem>>, %arg12: memref<1x32xf32, #tpu.memory_space<vmem>>, %arg13: memref<16x32xf32, #tpu.memory_space<vmem>>) attributes {dimension_semantics = [], scalar_prefetch = 0 : i64, scratch_operands = 0 : i64, tpu.core_type = #tpu.core_type<tc>} {
    %c0 = arith.constant 0 : index
    %c0_0 = arith.constant 0 : index
    %0 = vector.load %arg0[%c0, %c0_0] : memref<16x32xf32, #tpu.memory_space<vmem>>, vector<16x32xf32>
    %1 = arith.truncf %0 : vector<16x32xf32> to vector<16x32xbf16>
    %c0_1 = arith.constant 0 : index
    %c0_2 = arith.constant 0 : index
    %2 = vector.load %arg1[%c0_1, %c0_2] : memref<32x96xf32, #tpu.memory_space<vmem>>, vector<32x96xf32>
    %3 = arith.truncf %2 : vector<32x96xf32> to vector<32x96xbf16>
    %cst = arith.constant dense<0.000000e+00> : vector<16x96xf32>
    %4 = tpu.matmul %1, %3, %cst {dimension_numbers = #tpu.dot_dimension_numbers<[1], [0], [0], [1], [0, 0, 1, 1], [], []>} : vector<16x32xbf16>, vector<32x96xbf16>, vector<16x96xf32> -> vector<16x96xf32>
    %c0_3 = arith.constant 0 : index
    %c0_4 = arith.constant 0 : index
    %5 = vector.load %arg2[%c0_3, %c0_4] : memref<1x96xf32, #tpu.memory_space<vmem>>, vector<1x96xf32>
    %6 = vector.broadcast %5 : vector<1x96xf32> to vector<16x96xf32>
    %7 = arith.addf %4, %6 : vector<16x96xf32>
    %8 = vector.extract_strided_slice %7 {offsets = [0, 0], sizes = [16, 8], strides = [1, 1]} : vector<16x96xf32> to vector<16x8xf32>
    %9 = vector.shape_cast %8 : vector<16x8xf32> to vector<2x8x8xf32>
    %10 = arith.truncf %9 : vector<2x8x8xf32> to vector<2x8x8xbf16>
    %11 = vector.extract_strided_slice %7 {offsets = [0, 32], sizes = [16, 8], strides = [1, 1]} : vector<16x96xf32> to vector<16x8xf32>
    %12 = vector.shape_cast %11 : vector<16x8xf32> to vector<2x8x8xf32>
    %13 = arith.truncf %12 : vector<2x8x8xf32> to vector<2x8x8xbf16>
    %14 = vector.extract_strided_slice %7 {offsets = [0, 64], sizes = [16, 8], strides = [1, 1]} : vector<16x96xf32> to vector<16x8xf32>
    %15 = vector.shape_cast %14 : vector<16x8xf32> to vector<2x8x8xf32>
    %16 = arith.truncf %15 : vector<2x8x8xf32> to vector<2x8x8xbf16>
    "tpu.trace_start"() <{level = 10 : i32, message = "bqd,bkd->bqk"}> : () -> ()
    %cst_5 = arith.constant dense<0.000000e+00> : vector<2x8x8xf32>
    %17 = tpu.matmul %10, %13, %cst_5 {dimension_numbers = #tpu.dot_dimension_numbers<[2], [2], [1], [1], [0, 0, 0, 1, 1, 1], [0], [0]>} : vector<2x8x8xbf16>, vector<2x8x8xbf16>, vector<2x8x8xf32> -> vector<2x8x8xf32>
    "tpu.trace_stop"() : () -> ()
    %cst_6 = arith.constant 0.353553385 : f32
    %18 = vector.broadcast %cst_6 : f32 to vector<2x8x8xf32>
    %19 = arith.mulf %17, %18 : vector<2x8x8xf32>
    %cst_7 = arith.constant dense<0xFF800000> : vector<2x8xf32>
    %20 = vector.multi_reduction <maximumf>, %19, %cst_7 [2] : vector<2x8x8xf32> to vector<2x8xf32>
    %21 = vector.shape_cast %20 : vector<2x8xf32> to vector<2x8x1xf32>
    %22 = vector.broadcast %21 : vector<2x8x1xf32> to vector<2x8x8xf32>
    %23 = arith.subf %19, %22 : vector<2x8x8xf32>
    %24 = math.exp %23 : vector<2x8x8xf32>
    %cst_8 = arith.constant dense<0.000000e+00> : vector<2x8xf32>
    %25 = vector.multi_reduction <add>, %24, %cst_8 [2] : vector<2x8x8xf32> to vector<2x8xf32>
    %26 = vector.shape_cast %25 : vector<2x8xf32> to vector<2x8x1xf32>
    %27 = tpu.reciprocal %26 {approx = true} : vector<2x8x1xf32> -> vector<2x8x1xf32>
    %28 = vector.broadcast %27 : vector<2x8x1xf32> to vector<2x8x8xf32>
    %29 = arith.mulf %24, %28 : vector<2x8x8xf32>
    %30 = arith.truncf %29 : vector<2x8x8xf32> to vector<2x8x8xbf16>
    "tpu.trace_start"() <{level = 10 : i32, message = "bqk,bkd->bqd"}> : () -> ()
    %cst_9 = arith.constant dense<0.000000e+00> : vector<2x8x8xf32>
    %31 = tpu.matmul %30, %16, %cst_9 {dimension_numbers = #tpu.dot_dimension_numbers<[2], [1], [1], [2], [0, 0, 0, 1, 1, 2], [0], [0]>} : vector<2x8x8xbf16>, vector<2x8x8xbf16>, vector<2x8x8xf32> -> vector<2x8x8xf32>
    "tpu.trace_stop"() : () -> ()
    %32 = vector.shape_cast %31 : vector<2x8x8xf32> to vector<16x8xf32>
    %33 = vector.extract_strided_slice %7 {offsets = [0, 8], sizes = [16, 8], strides = [1, 1]} : vector<16x96xf32> to vector<16x8xf32>
    %34 = vector.shape_cast %33 : vector<16x8xf32> to vector<2x8x8xf32>
    %35 = arith.truncf %34 : vector<2x8x8xf32> to vector<2x8x8xbf16>
    %36 = vector.extract_strided_slice %7 {offsets = [0, 40], sizes = [16, 8], strides = [1, 1]} : vector<16x96xf32> to vector<16x8xf32>
    %37 = vector.shape_cast %36 : vector<16x8xf32> to vector<2x8x8xf32>
    %38 = arith.truncf %37 : vector<2x8x8xf32> to vector<2x8x8xbf16>
    %39 = vector.extract_strided_slice %7 {offsets = [0, 72], sizes = [16, 8], strides = [1, 1]} : vector<16x96xf32> to vector<16x8xf32>
    %40 = vector.shape_cast %39 : vector<16x8xf32> to vector<2x8x8xf32>
    %41 = arith.truncf %40 : vector<2x8x8xf32> to vector<2x8x8xbf16>
    "tpu.trace_start"() <{level = 10 : i32, message = "bqd,bkd->bqk"}> : () -> ()
    %cst_10 = arith.constant dense<0.000000e+00> : vector<2x8x8xf32>
    %42 = tpu.matmul %35, %38, %cst_10 {dimension_numbers = #tpu.dot_dimension_numbers<[2], [2], [1], [1], [0, 0, 0, 1, 1, 1], [0], [0]>} : vector<2x8x8xbf16>, vector<2x8x8xbf16>, vector<2x8x8xf32> -> vector<2x8x8xf32>
    "tpu.trace_stop"() : () -> ()
    %cst_11 = arith.constant 0.353553385 : f32
    %43 = vector.broadcast %cst_11 : f32 to vector<2x8x8xf32>
    %44 = arith.mulf %42, %43 : vector<2x8x8xf32>
    %cst_12 = arith.constant dense<0xFF800000> : vector<2x8xf32>
    %45 = vector.multi_reduction <maximumf>, %44, %cst_12 [2] : vector<2x8x8xf32> to vector<2x8xf32>
    %46 = vector.shape_cast %45 : vector<2x8xf32> to vector<2x8x1xf32>
    %47 = vector.broadcast %46 : vector<2x8x1xf32> to vector<2x8x8xf32>
    %48 = arith.subf %44, %47 : vector<2x8x8xf32>
    %49 = math.exp %48 : vector<2x8x8xf32>
    %cst_13 = arith.constant dense<0.000000e+00> : vector<2x8xf32>
    %50 = vector.multi_reduction <add>, %49, %cst_13 [2] : vector<2x8x8xf32> to vector<2x8xf32>
    %51 = vector.shape_cast %50 : vector<2x8xf32> to vector<2x8x1xf32>
    %52 = tpu.reciprocal %51 {approx = true} : vector<2x8x1xf32> -> vector<2x8x1xf32>
    %53 = vector.broadcast %52 : vector<2x8x1xf32> to vector<2x8x8xf32>
    %54 = arith.mulf %49, %53 : vector<2x8x8xf32>
    %55 = arith.truncf %54 : vector<2x8x8xf32> to vector<2x8x8xbf16>
    "tpu.trace_start"() <{level = 10 : i32, message = "bqk,bkd->bqd"}> : () -> ()
    %cst_14 = arith.constant dense<0.000000e+00> : vector<2x8x8xf32>
    %56 = tpu.matmul %55, %41, %cst_14 {dimension_numbers = #tpu.dot_dimension_numbers<[2], [1], [1], [2], [0, 0, 0, 1, 1, 2], [0], [0]>} : vector<2x8x8xbf16>, vector<2x8x8xbf16>, vector<2x8x8xf32> -> vector<2x8x8xf32>
    "tpu.trace_stop"() : () -> ()
    %57 = vector.shape_cast %56 : vector<2x8x8xf32> to vector<16x8xf32>
    %58 = vector.extract_strided_slice %7 {offsets = [0, 16], sizes = [16, 8], strides = [1, 1]} : vector<16x96xf32> to vector<16x8xf32>
    %59 = vector.shape_cast %58 : vector<16x8xf32> to vector<2x8x8xf32>
    %60 = arith.truncf %59 : vector<2x8x8xf32> to vector<2x8x8xbf16>
    %61 = vector.extract_strided_slice %7 {offsets = [0, 48], sizes = [16, 8], strides = [1, 1]} : vector<16x96xf32> to vector<16x8xf32>
    %62 = vector.shape_cast %61 : vector<16x8xf32> to vector<2x8x8xf32>
    %63 = arith.truncf %62 : vector<2x8x8xf32> to vector<2x8x8xbf16>
    %64 = vector.extract_strided_slice %7 {offsets = [0, 80], sizes = [16, 8], strides = [1, 1]} : vector<16x96xf32> to vector<16x8xf32>
    %65 = vector.shape_cast %64 : vector<16x8xf32> to vector<2x8x8xf32>
    %66 = arith.truncf %65 : vector<2x8x8xf32> to vector<2x8x8xbf16>
    "tpu.trace_start"() <{level = 10 : i32, message = "bqd,bkd->bqk"}> : () -> ()
    %cst_15 = arith.constant dense<0.000000e+00> : vector<2x8x8xf32>
    %67 = tpu.matmul %60, %63, %cst_15 {dimension_numbers = #tpu.dot_dimension_numbers<[2], [2], [1], [1], [0, 0, 0, 1, 1, 1], [0], [0]>} : vector<2x8x8xbf16>, vector<2x8x8xbf16>, vector<2x8x8xf32> -> vector<2x8x8xf32>
    "tpu.trace_stop"() : () -> ()
    %cst_16 = arith.constant 0.353553385 : f32
    %68 = vector.broadcast %cst_16 : f32 to vector<2x8x8xf32>
    %69 = arith.mulf %67, %68 : vector<2x8x8xf32>
    %cst_17 = arith.constant dense<0xFF800000> : vector<2x8xf32>
    %70 = vector.multi_reduction <maximumf>, %69, %cst_17 [2] : vector<2x8x8xf32> to vector<2x8xf32>
    %71 = vector.shape_cast %70 : vector<2x8xf32> to vector<2x8x1xf32>
    %72 = vector.broadcast %71 : vector<2x8x1xf32> to vector<2x8x8xf32>
    %73 = arith.subf %69, %72 : vector<2x8x8xf32>
    %74 = math.exp %73 : vector<2x8x8xf32>
    %cst_18 = arith.constant dense<0.000000e+00> : vector<2x8xf32>
    %75 = vector.multi_reduction <add>, %74, %cst_18 [2] : vector<2x8x8xf32> to vector<2x8xf32>
    %76 = vector.shape_cast %75 : vector<2x8xf32> to vector<2x8x1xf32>
    %77 = tpu.reciprocal %76 {approx = true} : vector<2x8x1xf32> -> vector<2x8x1xf32>
    %78 = vector.broadcast %77 : vector<2x8x1xf32> to vector<2x8x8xf32>
    %79 = arith.mulf %74, %78 : vector<2x8x8xf32>
    %80 = arith.truncf %79 : vector<2x8x8xf32> to vector<2x8x8xbf16>
    "tpu.trace_start"() <{level = 10 : i32, message = "bqk,bkd->bqd"}> : () -> ()
    %cst_19 = arith.constant dense<0.000000e+00> : vector<2x8x8xf32>
    %81 = tpu.matmul %80, %66, %cst_19 {dimension_numbers = #tpu.dot_dimension_numbers<[2], [1], [1], [2], [0, 0, 0, 1, 1, 2], [0], [0]>} : vector<2x8x8xbf16>, vector<2x8x8xbf16>, vector<2x8x8xf32> -> vector<2x8x8xf32>
    "tpu.trace_stop"() : () -> ()
    %82 = vector.shape_cast %81 : vector<2x8x8xf32> to vector<16x8xf32>
    %83 = vector.extract_strided_slice %7 {offsets = [0, 24], sizes = [16, 8], strides = [1, 1]} : vector<16x96xf32> to vector<16x8xf32>
    %84 = vector.shape_cast %83 : vector<16x8xf32> to vector<2x8x8xf32>
    %85 = arith.truncf %84 : vector<2x8x8xf32> to vector<2x8x8xbf16>
    %86 = vector.extract_strided_slice %7 {offsets = [0, 56], sizes = [16, 8], strides = [1, 1]} : vector<16x96xf32> to vector<16x8xf32>
    %87 = vector.shape_cast %86 : vector<16x8xf32> to vector<2x8x8xf32>
    %88 = arith.truncf %87 : vector<2x8x8xf32> to vector<2x8x8xbf16>
    %89 = vector.extract_strided_slice %7 {offsets = [0, 88], sizes = [16, 8], strides = [1, 1]} : vector<16x96xf32> to vector<16x8xf32>
    %90 = vector.shape_cast %89 : vector<16x8xf32> to vector<2x8x8xf32>
    %91 = arith.truncf %90 : vector<2x8x8xf32> to vector<2x8x8xbf16>
    "tpu.trace_start"() <{level = 10 : i32, message = "bqd,bkd->bqk"}> : () -> ()
    %cst_20 = arith.constant dense<0.000000e+00> : vector<2x8x8xf32>
    %92 = tpu.matmul %85, %88, %cst_20 {dimension_numbers = #tpu.dot_dimension_numbers<[2], [2], [1], [1], [0, 0, 0, 1, 1, 1], [0], [0]>} : vector<2x8x8xbf16>, vector<2x8x8xbf16>, vector<2x8x8xf32> -> vector<2x8x8xf32>
    "tpu.trace_stop"() : () -> ()
    %cst_21 = arith.constant 0.353553385 : f32
    %93 = vector.broadcast %cst_21 : f32 to vector<2x8x8xf32>
    %94 = arith.mulf %92, %93 : vector<2x8x8xf32>
    %cst_22 = arith.constant dense<0xFF800000> : vector<2x8xf32>
    %95 = vector.multi_reduction <maximumf>, %94, %cst_22 [2] : vector<2x8x8xf32> to vector<2x8xf32>
    %96 = vector.shape_cast %95 : vector<2x8xf32> to vector<2x8x1xf32>
    %97 = vector.broadcast %96 : vector<2x8x1xf32> to vector<2x8x8xf32>
    %98 = arith.subf %94, %97 : vector<2x8x8xf32>
    %99 = math.exp %98 : vector<2x8x8xf32>
    %cst_23 = arith.constant dense<0.000000e+00> : vector<2x8xf32>
    %100 = vector.multi_reduction <add>, %99, %cst_23 [2] : vector<2x8x8xf32> to vector<2x8xf32>
    %101 = vector.shape_cast %100 : vector<2x8xf32> to vector<2x8x1xf32>
    %102 = tpu.reciprocal %101 {approx = true} : vector<2x8x1xf32> -> vector<2x8x1xf32>
    %103 = vector.broadcast %102 : vector<2x8x1xf32> to vector<2x8x8xf32>
    %104 = arith.mulf %99, %103 : vector<2x8x8xf32>
    %105 = arith.truncf %104 : vector<2x8x8xf32> to vector<2x8x8xbf16>
    "tpu.trace_start"() <{level = 10 : i32, message = "bqk,bkd->bqd"}> : () -> ()
    %cst_24 = arith.constant dense<0.000000e+00> : vector<2x8x8xf32>
    %106 = tpu.matmul %105, %91, %cst_24 {dimension_numbers = #tpu.dot_dimension_numbers<[2], [1], [1], [2], [0, 0, 0, 1, 1, 2], [0], [0]>} : vector<2x8x8xbf16>, vector<2x8x8xbf16>, vector<2x8x8xf32> -> vector<2x8x8xf32>
    "tpu.trace_stop"() : () -> ()
    %107 = vector.shape_cast %106 : vector<2x8x8xf32> to vector<16x8xf32>
    %108 = tpu.concatenate %32, %57, %82, %107 in 1 : vector<16x8xf32>, vector<16x8xf32>, vector<16x8xf32>, vector<16x8xf32> -> vector<16x32xf32>
    %109 = arith.truncf %108 : vector<16x32xf32> to vector<16x32xbf16>
    %c0_25 = arith.constant 0 : index
    %c0_26 = arith.constant 0 : index
    %110 = vector.load %arg3[%c0_25, %c0_26] : memref<32x32xf32, #tpu.memory_space<vmem>>, vector<32x32xf32>
    %111 = arith.truncf %110 : vector<32x32xf32> to vector<32x32xbf16>
    %cst_27 = arith.constant dense<0.000000e+00> : vector<16x32xf32>
    %112 = tpu.matmul %109, %111, %cst_27 {dimension_numbers = #tpu.dot_dimension_numbers<[1], [0], [0], [1], [0, 0, 1, 1], [], []>} : vector<16x32xbf16>, vector<32x32xbf16>, vector<16x32xf32> -> vector<16x32xf32>
    %c0_28 = arith.constant 0 : index
    %c0_29 = arith.constant 0 : index
    %113 = vector.load %arg4[%c0_28, %c0_29] : memref<1x32xf32, #tpu.memory_space<vmem>>, vector<1x32xf32>
    %114 = vector.broadcast %113 : vector<1x32xf32> to vector<16x32xf32>
    %115 = arith.addf %112, %114 : vector<16x32xf32>
    %116 = arith.addf %115, %0 : vector<16x32xf32>
    %c0_30 = arith.constant 0 : index
    %c0_31 = arith.constant 0 : index
    %117 = vector.load %arg5[%c0_30, %c0_31] : memref<1x32xf32, #tpu.memory_space<vmem>>, vector<1x32xf32>
    %c0_32 = arith.constant 0 : index
    %c0_33 = arith.constant 0 : index
    %118 = vector.load %arg6[%c0_32, %c0_33] : memref<1x32xf32, #tpu.memory_space<vmem>>, vector<1x32xf32>
    %cst_34 = arith.constant dense<0.000000e+00> : vector<16xf32>
    %119 = vector.multi_reduction <add>, %116, %cst_34 [1] : vector<16x32xf32> to vector<16xf32>
    %120 = vector.shape_cast %119 : vector<16xf32> to vector<16x1xf32>
    %cst_35 = arith.constant 3.200000e+01 : f32
    %121 = vector.broadcast %cst_35 : f32 to vector<16x1xf32>
    %122 = arith.divf %120, %121 : vector<16x1xf32>
    %123 = vector.broadcast %122 : vector<16x1xf32> to vector<16x32xf32>
    %124 = arith.subf %116, %123 : vector<16x32xf32>
    %125 = arith.mulf %124, %124 : vector<16x32xf32>
    %cst_36 = arith.constant dense<0.000000e+00> : vector<16xf32>
    %126 = vector.multi_reduction <add>, %125, %cst_36 [1] : vector<16x32xf32> to vector<16xf32>
    %127 = vector.shape_cast %126 : vector<16xf32> to vector<16x1xf32>
    %cst_37 = arith.constant 3.200000e+01 : f32
    %128 = vector.broadcast %cst_37 : f32 to vector<16x1xf32>
    %129 = arith.divf %127, %128 : vector<16x1xf32>
    %130 = vector.broadcast %122 : vector<16x1xf32> to vector<16x32xf32>
    %131 = arith.subf %116, %130 : vector<16x32xf32>
    %cst_38 = arith.constant 9.99999996E-13 : f32
    %132 = vector.broadcast %cst_38 : f32 to vector<16x1xf32>
    %133 = arith.addf %129, %132 : vector<16x1xf32>
    %134 = math.rsqrt %133 : vector<16x1xf32>
    %135 = vector.broadcast %134 : vector<16x1xf32> to vector<16x32xf32>
    %136 = arith.mulf %131, %135 : vector<16x32xf32>
    %137 = vector.broadcast %117 : vector<1x32xf32> to vector<16x32xf32>
    %138 = arith.mulf %136, %137 : vector<16x32xf32>
    %139 = vector.broadcast %118 : vector<1x32xf32> to vector<16x32xf32>
    %140 = arith.addf %138, %139 : vector<16x32xf32>
    %141 = arith.truncf %140 : vector<16x32xf32> to vector<16x32xbf16>
    %c0_39 = arith.constant 0 : index
    %c0_40 = arith.constant 0 : index
    %142 = vector.load %arg7[%c0_39, %c0_40] : memref<32x64xf32, #tpu.memory_space<vmem>>, vector<32x64xf32>
    %143 = arith.truncf %142 : vector<32x64xf32> to vector<32x64xbf16>
    %cst_41 = arith.constant dense<0.000000e+00> : vector<16x64xf32>
    %144 = tpu.matmul %141, %143, %cst_41 {dimension_numbers = #tpu.dot_dimension_numbers<[1], [0], [0], [1], [0, 0, 1, 1], [], []>} : vector<16x32xbf16>, vector<32x64xbf16>, vector<16x64xf32> -> vector<16x64xf32>
    %c0_42 = arith.constant 0 : index
    %c0_43 = arith.constant 0 : index
    %145 = vector.load %arg8[%c0_42, %c0_43] : memref<1x64xf32, #tpu.memory_space<vmem>>, vector<1x64xf32>
    %146 = vector.broadcast %145 : vector<1x64xf32> to vector<16x64xf32>
    %147 = arith.addf %144, %146 : vector<16x64xf32>
    %cst_44 = arith.constant 5.000000e-01 : f32
    %148 = vector.broadcast %cst_44 : f32 to vector<16x64xf32>
    %149 = arith.mulf %148, %147 : vector<16x64xf32>
    %cst_45 = arith.constant 0.707106769 : f32
    %150 = vector.broadcast %cst_45 : f32 to vector<16x64xf32>
    %151 = arith.mulf %147, %150 : vector<16x64xf32>
    %152 = math.erf %151 : vector<16x64xf32>
    %cst_46 = arith.constant 1.000000e+00 : f32
    %153 = vector.broadcast %cst_46 : f32 to vector<16x64xf32>
    %154 = arith.addf %153, %152 : vector<16x64xf32>
    %155 = arith.mulf %149, %154 : vector<16x64xf32>
    %156 = arith.truncf %155 : vector<16x64xf32> to vector<16x64xbf16>
    %c0_47 = arith.constant 0 : index
    %c0_48 = arith.constant 0 : index
    %157 = vector.load %arg9[%c0_47, %c0_48] : memref<64x32xf32, #tpu.memory_space<vmem>>, vector<64x32xf32>
    %158 = arith.truncf %157 : vector<64x32xf32> to vector<64x32xbf16>
    %cst_49 = arith.constant dense<0.000000e+00> : vector<16x32xf32>
    %159 = tpu.matmul %156, %158, %cst_49 {dimension_numbers = #tpu.dot_dimension_numbers<[1], [0], [0], [1], [0, 0, 1, 1], [], []>} : vector<16x64xbf16>, vector<64x32xbf16>, vector<16x32xf32> -> vector<16x32xf32>
    %c0_50 = arith.constant 0 : index
    %c0_51 = arith.constant 0 : index
    %160 = vector.load %arg10[%c0_50, %c0_51] : memref<1x32xf32, #tpu.memory_space<vmem>>, vector<1x32xf32>
    %161 = vector.broadcast %160 : vector<1x32xf32> to vector<16x32xf32>
    %162 = arith.addf %159, %161 : vector<16x32xf32>
    %163 = arith.addf %162, %140 : vector<16x32xf32>
    %c0_52 = arith.constant 0 : index
    %c0_53 = arith.constant 0 : index
    %164 = vector.load %arg11[%c0_52, %c0_53] : memref<1x32xf32, #tpu.memory_space<vmem>>, vector<1x32xf32>
    %c0_54 = arith.constant 0 : index
    %c0_55 = arith.constant 0 : index
    %165 = vector.load %arg12[%c0_54, %c0_55] : memref<1x32xf32, #tpu.memory_space<vmem>>, vector<1x32xf32>
    %cst_56 = arith.constant dense<0.000000e+00> : vector<16xf32>
    %166 = vector.multi_reduction <add>, %163, %cst_56 [1] : vector<16x32xf32> to vector<16xf32>
    %167 = vector.shape_cast %166 : vector<16xf32> to vector<16x1xf32>
    %cst_57 = arith.constant 3.200000e+01 : f32
    %168 = vector.broadcast %cst_57 : f32 to vector<16x1xf32>
    %169 = arith.divf %167, %168 : vector<16x1xf32>
    %170 = vector.broadcast %169 : vector<16x1xf32> to vector<16x32xf32>
    %171 = arith.subf %163, %170 : vector<16x32xf32>
    %172 = arith.mulf %171, %171 : vector<16x32xf32>
    %cst_58 = arith.constant dense<0.000000e+00> : vector<16xf32>
    %173 = vector.multi_reduction <add>, %172, %cst_58 [1] : vector<16x32xf32> to vector<16xf32>
    %174 = vector.shape_cast %173 : vector<16xf32> to vector<16x1xf32>
    %cst_59 = arith.constant 3.200000e+01 : f32
    %175 = vector.broadcast %cst_59 : f32 to vector<16x1xf32>
    %176 = arith.divf %174, %175 : vector<16x1xf32>
    %177 = vector.broadcast %169 : vector<16x1xf32> to vector<16x32xf32>
    %178 = arith.subf %163, %177 : vector<16x32xf32>
    %cst_60 = arith.constant 9.99999996E-13 : f32
    %179 = vector.broadcast %cst_60 : f32 to vector<16x1xf32>
    %180 = arith.addf %176, %179 : vector<16x1xf32>
    %181 = math.rsqrt %180 : vector<16x1xf32>
    %182 = vector.broadcast %181 : vector<16x1xf32> to vector<16x32xf32>
    %183 = arith.mulf %178, %182 : vector<16x32xf32>
    %184 = vector.broadcast %164 : vector<1x32xf32> to vector<16x32xf32>
    %185 = arith.mulf %183, %184 : vector<16x32xf32>
    %186 = vector.broadcast %165 : vector<1x32xf32> to vector<16x32xf32>
    %187 = arith.addf %185, %186 : vector<16x32xf32>
    %c0_61 = arith.constant 0 : index
    %c0_62 = arith.constant 0 : index
    %188 = vector.load %arg13[%c0_61, %c0_62] : memref<16x32xf32, #tpu.memory_space<vmem>>, vector<16x32xf32>
    tpu.vector_store %arg13[%c0_61, %c0_62], %187 {strides = array<i32>} : memref<16x32xf32, #tpu.memory_space<vmem>>, vector<16x32xf32>,
    return
  }
}

module attributes {stable_mosaic.version = 11 : i64} {
  func.func @_conv1d_im2col_kernel(%arg0: memref<2x10x32xf32, #tpu.memory_space<vmem>>, %arg1: memref<96x32xf32, #tpu.memory_space<vmem>>, %arg2: memref<2x8x32xf32, #tpu.memory_space<vmem>>) attributes {dimension_semantics = [], scalar_prefetch = 0 : i64, scratch_operands = 0 : i64, tpu.core_type = #tpu.core_type<tc>} {
    %c0 = arith.constant 0 : index
    %c0_0 = arith.constant 0 : index
    %c0_1 = arith.constant 0 : index
    %0 = vector.load %arg0[%c0, %c0_0, %c0_1] : memref<2x10x32xf32, #tpu.memory_space<vmem>>, vector<2x10x32xf32>
    %1 = vector.extract_strided_slice %0 {offsets = [0, 0, 0], sizes = [2, 8, 32], strides = [1, 1, 1]} : vector<2x10x32xf32> to vector<2x8x32xf32>
    %2 = vector.shape_cast %1 : vector<2x8x32xf32> to vector<16x32xf32>
    %3 = vector.extract_strided_slice %0 {offsets = [0, 1, 0], sizes = [2, 8, 32], strides = [1, 1, 1]} : vector<2x10x32xf32> to vector<2x8x32xf32>
    %4 = vector.shape_cast %3 : vector<2x8x32xf32> to vector<16x32xf32>
    %5 = vector.extract_strided_slice %0 {offsets = [0, 2, 0], sizes = [2, 8, 32], strides = [1, 1, 1]} : vector<2x10x32xf32> to vector<2x8x32xf32>
    %6 = vector.shape_cast %5 : vector<2x8x32xf32> to vector<16x32xf32>
    %7 = tpu.concatenate %2, %4, %6 in 1 : vector<16x32xf32>, vector<16x32xf32>, vector<16x32xf32> -> vector<16x96xf32>
    %8 = arith.truncf %7 : vector<16x96xf32> to vector<16x96xbf16>
    %c0_2 = arith.constant 0 : index
    %c0_3 = arith.constant 0 : index
    %9 = vector.load %arg1[%c0_2, %c0_3] : memref<96x32xf32, #tpu.memory_space<vmem>>, vector<96x32xf32>
    %10 = arith.truncf %9 : vector<96x32xf32> to vector<96x32xbf16>
    %cst = arith.constant dense<0.000000e+00> : vector<16x32xf32>
    %11 = tpu.matmul %8, %10, %cst {dimension_numbers = #tpu.dot_dimension_numbers<[1], [0], [0], [1], [0, 0, 1, 1], [], []>} : vector<16x96xbf16>, vector<96x32xbf16>, vector<16x32xf32> -> vector<16x32xf32>
    %12 = vector.shape_cast %11 : vector<16x32xf32> to vector<2x8x32xf32>
    %c0_4 = arith.constant 0 : index
    %c0_5 = arith.constant 0 : index
    %c0_6 = arith.constant 0 : index
    %13 = vector.load %arg2[%c0_4, %c0_5, %c0_6] : memref<2x8x32xf32, #tpu.memory_space<vmem>>, vector<2x8x32xf32>
    tpu.vector_store %arg2[%c0_4, %c0_5, %c0_6], %12 {strides = array<i32>} : memref<2x8x32xf32, #tpu.memory_space<vmem>>, vector<2x8x32xf32>,
    return
  }
}

</mosaic_0001>

<bundles_post_ra>
// kernel: bert_cnn_forward.4
= control target key start
LH: loop header
LB: loop body
LE: loop exit
PB: predicated region body
PF: predicated region fallthrough
CT: control target
= control target key end

     0   :  { %vm18_vm0 = vcmask 261120   ;;  %s118_s0 = inlined_call_operand.vmem [shape: f32[16,32], index: 0, kind: input, shape index: {}]   ;;  %s119_s1 = inlined_call_operand.vmem [shape: f32[1,32], index: 1, kind: input, shape index: {}]   ;;  %s120_s2 = inlined_call_operand.vmem [shape: f32[1,32], index: 2, kind: input, shape index: {}]   ;;  %s121_s3 = inlined_call_operand.vmem [shape: f32[16,32], index: 3, kind: output, shape index: {}]  }
   0x1   :  { %v14_v0 = vld [vmem:[%s118_s0] sm:$0xff]  ;;  %v15_v1 = vld [vmem:[%s118_s0 + $0x8] sm:$0xff] }
   0x2   :  { %v19_v2 = vsel %vm18_vm0, %v14_v0, 0.0  ;;  %v22_v3 = vsel %vm18_vm0, %v15_v1, 0.0  ;;  %v68_v21 = vld [vmem:[%s119_s1] ss:$0 sm:$0xff] }
   0x3   :  { %20 = vadd.xlane.f32.xlu0 %v19_v2  ;;  %v69_v23 = vld [vmem:[%s120_s2] ss:$0 sm:$0xff] }
   0x7   :  { %23 = vadd.xlane.f32.xlu0 %v22_v3 }
  0x8c   :  { %v21_v4 = vpop.xlane.xlu0 %20 }
  0x8d   :  { %v26_v5 = vmul.f32 0.03125, %v21_v4 }
  0x8f   :  { %v28_v6 = vsub.f32 %v14_v0, %v26_v5 }
  0x90   :  { %v24_v7 = vpop.xlane.xlu0 %23 }
  0x91   :  { %v27_v8 = vmul.f32 0.03125, %v24_v7  ;;  %v30_v9 = vmul.f32 %v28_v6, %v28_v6 }
  0x93   :  { %v29_v10 = vsub.f32 %v15_v1, %v27_v8  ;;  %v32_v11 = vsel %vm18_vm0, %v30_v9, 0.0 }
  0x94   :  { %33 = vadd.xlane.f32.xlu1 %v32_v11 }
  0x95   :  { %v31_v12 = vmul.f32 %v29_v10, %v29_v10 }
  0x97   :  { %v35_v13 = vsel %vm18_vm0, %v31_v12, 0.0 }
  0x98   :  { %36 = vadd.xlane.f32.xlu1 %v35_v13 }
 0x11d   :  { %v34_v14 = vpop.xlane.xlu1 %33 }
 0x11e   :  { %v38_v15 = vmul.f32 0.03125, %v34_v14 }
 0x120   :  { %v40_v16 = vadd.f32 1e-12, %v38_v15 }
 0x121   :  { %v37_v17 = vpop.xlane.xlu1 %36 }
 0x122   :  { %70 = vrsqrt.f32 %v40_v16  ;;  %v39_v18 = vmul.f32 0.03125, %v37_v17 }
 0x124   :  { %v41_v19 = vadd.f32 1e-12, %v39_v18 }
 0x126   :  { %72 = vrsqrt.f32 %v41_v19 }
 0x12f   :  { %v71_v20 = vpop.eup %70 }
 0x130   :  { %v44_v22 = vmul.f32 %v71_v20, %v28_v6 }
 0x132   :  { %v52_v24 = vmul.f32 %v68_v21, %v44_v22 }
 0x133   :  { %v73_v25 = vpop.eup %72 }
 0x134   :  { %v60_v26 = vadd.f32 %v69_v23, %v52_v24  ;;  %v45_v27 = vmul.f32 %v73_v25, %v29_v10 }
 0x136   :  { %62 = vst.msk [vmem:[%s121_s3] sm:$0xff] %vm18_vm0, %v60_v26  ;;  %v53_v28 = vmul.f32 %v68_v21, %v45_v27 }
 0x138   :  { %v61_v29 = vadd.f32 %v69_v23, %v53_v28 }
 0x13a   :  { %63 = vst.msk [vmem:[%s121_s3 + $0x8] sm:$0xff] %vm18_vm0, %v61_v29 }

// kernel: bert_cnn_forward.7
= control target key start
LH: loop header
LB: loop body
LE: loop exit
PB: predicated region body
PF: predicated region fallthrough
CT: control target
= control target key end

     0   :  { %vm21_vm0 = vcmask 1046528   ;;  %vm28_vm1 = vcmask 1045504   ;;  %v198_v19 = vmov 0.0   ;;  %s287_s0 = inlined_call_operand.vmem [shape: f32[2,10,32], index: 0, kind: input, shape index: {}]   ;;  %s288_s1 = inlined_call_operand.vmem [shape: f32[96,32], index: 1, kind: input, shape index: {}]   ;;  %s289_s2 = inlined_call_operand.hbm [shape: f32[2,8,32], index: 2, kind: output, shape index: {}]  }
   0x1   :  { %v223_v0 = vld [vmem:[%s287_s0] sm:$0xff]  ;;  %v14_v1 = vld [vmem:[%s287_s0 + $0x8] sm:$0x3]  ;;  %v231_v2 = vld [vmem:[%s287_s0 + $0x10] sm:$0xff]  ;;  %143 = vmatprep.subr.bf16.mxu0 %v198_v19 }
   0x2   :  { %v16_v3 = vld [vmem:[%s287_s0 + $0x18] sm:$0x3]  ;;  %v22_v4 = vrot.slane %v223_v0, 1  ;;  %v23_v5 = vrot.slane %v14_v1, 1  ;;  %v25_v6 = vrot.slane %v231_v2, 1  ;;  %v30_v7 = vrot.slane %v14_v1, 2 }
   0x3   :  { %v26_v8 = vrot.slane %v16_v3, 1  ;;  %v33_v9 = vrot.slane %v16_v3, 2  ;;  %v29_v10 = vrot.slane %v223_v0, 2  ;;  %v64_v11 = vld [vmem:[%s288_s1 + $0x50] sm:$0xff]  ;;  %v32_v13 = vrot.slane %v231_v2, 2  ;;  %v65_v14 = vld [vmem:[%s288_s1 + $0x58] sm:$0xff] }
   0x4   :  { %v24_v12 = vsel %vm21_vm0, %v22_v4, %v23_v5  ;;  %v62_v15 = vld [vmem:[%s288_s1 + $0x40] sm:$0xff]  ;;  %v63_v16 = vld [vmem:[%s288_s1 + $0x48] sm:$0xff]  ;;  %v71_v20 = vpack.c.bf16 %v65_v14, %v64_v11 }
   0x5   :  { %v27_v17 = vsel %vm21_vm0, %v25_v6, %v26_v8  ;;  %v31_v18 = vsel %vm28_vm1, %v29_v10, %v30_v7  ;;  %v34_v22 = vsel %vm28_vm1, %v32_v13, %v33_v9  ;;  %v70_v23 = vpack.c.bf16 %v63_v16, %v62_v15 }
   0x6   :  { %v166_v21 = vpack.i.bf16 %v27_v17, %v24_v12  ;;  %144 = vmatpush3.bf16.msra.mxu0 %v71_v20 }
   0x7   :  { %7 = vsyncpa [#allocation3], 0  ;;  %s199_s24 = smov 32   ;;  %v171_v24 = vpack.i.bf16 %v34_v22, %v31_v18  ;;  %145 = vmatprep.subr.bf16.mxu0 %v198_v19  ;;  %v60_v25 = vld [vmem:[%s288_s1 + $0x30] sm:$0xff]  ;;  %v61_v26 = vld [vmem:[%s288_s1 + $0x38] sm:$0xff]  ;;  %vm200_vm2 = vmmov 0  }
   0x8   :  { %167 = vrot.lane.b32.xlu0 %v166_v21, %s199_s24  ;;  %155 = vmatprep.mubr.msk.bf16.mxu0 %vm200_vm2, %v198_v19  ;;  %v69_v27 = vpack.c.bf16 %v61_v26, %v60_v25  ;;  %s201_s29 = smov 64   ;;  %v58_v28 = vld [vmem:[%s288_s1 + $0x20] sm:$0xff]  ;;  %v59_v29 = vld [vmem:[%s288_s1 + $0x28] sm:$0xff]  ;;  %v56_v31 = vld [vmem:[%s288_s1 + $0x10] sm:$0xff]  ;;  %vm47_vm3 = vcmask 261120   ;;  %vm50_vm4 = vcmask 523264  }
   0x9   :  { %v68_v30 = vpack.c.bf16 %v59_v29, %v58_v28  ;;  %v57_v32 = vld [vmem:[%s288_s1 + $0x18] sm:$0xff]  ;;  %v54_v34 = vld [vmem:[%s288_s1] sm:$0xff]  ;;  %v55_v35 = vld [vmem:[%s288_s1 + $0x8] sm:$0xff]  ;;  %vm72_vm5 = vcmask 785408   ;;  %s202_s1 = smov [#allocation2]  }
   0xa   :  { %146 = vmatpush3.bf16.msra.mxu0 %v70_v23  ;;  %v67_v33 = vpack.c.bf16 %v57_v32, %v56_v31  ;;  %v66_v36 = vpack.c.bf16 %v55_v35, %v54_v34  ;;  %s124_s14 = sshll.u32 %s202_s1, 4  ;;  %s125_s14 = int_to_ptr.vmem [resolvable:$true] %s124_s14 }
   0xb   :  { %147 = vmatprep.subr.bf16.mxu0 %v198_v19  ;;  %s176_s15 = scalar_lea.vmem %s125_s14, 256  ;;  %p181_p1 = scmp.lt.s32.totalorder %s125_s14, %s125_s14 }
   0xc   :  { %172 = vrot.lane.b32.xlu0 %v171_v24, %s201_s29  ;;  %p177_p0 = scmp.ne.s32.totalorder %s125_s14, %s176_s15  ;;  %p182_p2 = scmp.lt.s32.totalorder %s176_s15, %s176_s15 }
   0xe   :  { %148 = vmatpush3.bf16.msra.mxu0 %v69_v27  ;;  %p183_p3 = por %p182_p2, %p181_p1 }
   0xf   :  { %149 = vmatprep.subr.bf16.mxu0 %v198_v19 }
  0x10   :  { %p184_p4 = pnand %p183_p3, %p177_p0 }
  0x12   :  { %150 = vmatpush3.bf16.msra.mxu0 %v68_v30 }
  0x13   :  { %151 = vmatprep.subr.bf16.mxu0 %v198_v19 }
  0x16   :  { %152 = vmatpush3.bf16.msra.mxu0 %v67_v33 }
  0x17   :  { %153 = vmatprep.subr.bf16.mxu0 %v198_v19 }
  0x1a   :  { %154 = vmatpush3.bf16.msra.mxu0 %v66_v36 }
  0x7a   :  { %v168_v37 = vpop.permute.xlu0 %167 }
  0x7b   :  { %v170_v38 = vunpack.i.h.bf16 %v168_v37  ;;  %v169_v39 = vunpack.i.l.bf16 %v168_v37 }
  0x7d   :  { %v49_v43 = vsel %vm47_vm3, %v231_v2, %v170_v38  ;;  %v48_v44 = vsel %vm47_vm3, %v223_v0, %v169_v39 }
  0x7e   :  { %v173_v40 = vpop.permute.xlu0 %172 }
  0x7f   :  { %v175_v41 = vunpack.i.h.bf16 %v173_v40  ;;  %v174_v42 = vunpack.i.l.bf16 %v173_v40 }
  0x81   :  { %v51_v45 = vsel %vm50_vm4, %v48_v44, %v174_v42  ;;  %v52_v46 = vsel %vm50_vm4, %v49_v43, %v175_v41 }
  0x82   :  { %v53_v47 = vpack.c.bf16 %v52_v46, %v51_v45 }
  0x84   :  { %156 = vmatmul.mubr.msk.bf16.vlgmr.msra.gmra.mxu0 %vm72_vm5, %v53_v47 }
 0x144   :  { %v110_v48 = vpop.f32.mrf.mxu0 }
 0x145   :  { %117 = vst.msk [vmem:[#allocation2] sm:$0xff] %vm47_vm3, %v110_v48 }
 0x146   :  { %v157_v49 = vpop.f32.mrf.mxu0 }
 0x148   :  { %v113_v50 = vpop.f32.mrf.mxu0 }
 0x149   :  { %118 = vst.msk [vmem:[#allocation2 + $0x8] sm:$0xff] %vm47_vm3, %v113_v50 }
 0x14a   :  { %v158_v51 = vpop.f32.mrf.mxu0 }
 0x14b   :  { %187 = shalt.err (!%p184_p4)
}
 0x14c   :  { %s203_s16 = smov 128   ;;  %s204_s17 = smov 8  }
 0x14d   :  { %130 = dma.vmem_to_hbm [thread:$0]  %s125_s14, 256, %s289_s2, [#allocation3], %s203_s16, %s203_s16, %s204_s17  }
 0x14e   :  { %196 = dma.done.wait [#allocation3], 256  }
 0x14f   :  { %197 = vsyncadd [#allocation3], 4294967040 }
 0x150   :  { %134 = vsyncpa [#allocation3], 1 }

// kernel: bert_cnn_forward.5
= control target key start
LH: loop header
LB: loop body
LE: loop exit
PB: predicated region body
PF: predicated region fallthrough
CT: control target
= control target key end

     0   :  { %v1599_v0 = vmov 0.0   ;;  %vm1600_vm0 = vmmov 0   ;;  %vm61_vm1 = vcmask 261120   ;;  %vm111_vm2 = vcmask 64512   ;;  %s1603_s21 = smov 88   ;;  %s1604_s22 = smov 120   ;;  %s1961_s1 = inlined_call_operand.vmem [shape: f32[32,96], index: 1, kind: input, shape index: {}]   ;;  %s1962_s0 = inlined_call_operand.vmem [shape: f32[16,32], index: 0, kind: input, shape index: {}]   ;;  %s1963_s2 = inlined_call_operand.vmem [shape: f32[1,96], index: 2, kind: input, shape index: {}]   ;;  %s1964_s3 = inlined_call_operand.vmem [shape: f32[32,32], index: 3, kind: input, shape index: {}]   ;;  %s1965_s4 = inlined_call_operand.vmem [shape: f32[1,32], index: 4, kind: input, shape index: {}]   ;;  %s1966_s7 = inlined_call_operand.vmem [shape: f32[32,64], index: 7, kind: input, shape index: {}]   ;;  %s1967_s5 = inlined_call_operand.vmem [shape: f32[1,32], index: 5, kind: input, shape index: {}]   ;;  %s1968_s6 = inlined_call_operand.vmem [shape: f32[1,32], index: 6, kind: input, shape index: {}]   ;;  %s1969_s9 = inlined_call_operand.vmem [shape: f32[64,32], index: 9, kind: input, shape index: {}]   ;;  %s1970_s8 = inlined_call_operand.vmem [shape: f32[1,64], index: 8, kind: input, shape index: {}]   ;;  %s1971_s10 = inlined_call_operand.vmem [shape: f32[1,32], index: 10, kind: input, shape index: {}]   ;;  %s1972_s11 = inlined_call_operand.vmem [shape: f32[1,32], index: 11, kind: input, shape index: {}]   ;;  %s1973_s12 = inlined_call_operand.vmem [shape: f32[1,32], index: 12, kind: input, shape index: {}]   ;;  %s1974_s13 = inlined_call_operand.vmem [shape: f32[16,32], index: 13, kind: output, shape index: {}]  }
   0x1   :  { %1392 = vmatprep.subr.bf16.mxu0 %v1599_v0  ;;  %v50_v1 = vld [vmem:[%s1961_s1 + $0x10] sm:$0xff]  ;;  %v51_v2 = vld [vmem:[%s1961_s1 + $0x18] sm:$0xff]  ;;  %v48_v3 = vld [vmem:[%s1961_s1] sm:$0xff]  ;;  %1396 = vmatprep.mubr.msk.bf16.mxu0 %vm1600_vm0, %v1599_v0  ;;  %vm238_vm3 = vcmask 1043456   ;;  %s1605_s23 = smov 56   ;;  %s1606_s24 = smov 80  }
   0x2   :  { %v53_v4 = vpack.c.bf16 %v51_v2, %v50_v1  ;;  %v49_v5 = vld [vmem:[%s1961_s1 + $0x8] sm:$0xff]  ;;  %1400 = vmatprep.subr.bf16.mxu1 %v1599_v0  ;;  %1402 = vmatprep.mubr.msk.bf16.mxu1 %vm1600_vm0, %v1599_v0  ;;  %v1706_v7 = vld [vmem:[%s1962_s0] sm:$0xff]  ;;  %s1607_s25 = smov 112   ;;  %s1608_s26 = smov 48   ;;  %vm1022_vm4 = vcmask 130048   ;;  %vm1025_vm5 = vcmask 195584  }
   0x3   :  { %v52_v6 = vpack.c.bf16 %v49_v5, %v48_v3  ;;  %v1711_v8 = vld [vmem:[%s1962_s0 + $0x8] sm:$0xff]  ;;  %v1318_v10 = vld [vmem:[%s1963_s2] ss:$0 sm:$0xff]  ;;  %s1601_s0 = smov 96   ;;  %s1602_s2 = smov 64   ;;  %vm1221_vm6 = vcmask 523264  }
   0x4   :  { %1393 = vmatpush3.bf16.msra.mxu0 %v53_v4  ;;  %v47_v9 = vpack.c.bf16 %v1711_v8, %v1706_v7  ;;  %s1609_s27 = smov 72   ;;  %s1610_s28 = smov 104  }
   0x5   :  { %1394 = vmatprep.subr.bf16.mxu0 %v1599_v0  ;;  %s1611_s29 = smov 40   ;;  %s1612_s30 = smov 8  }
   0x6   :  { %s1613_s14 = smov 16  }
   0x8   :  { %1395 = vmatpush3.bf16.msra.mxu0 %v52_v6 }
   0x9   :  { %1406 = vmatprep.subr.bf16.mxu0 %v1599_v0 }
   0xb   :  { %1397 = vmatmul.mubr.msk.bf16.vlgmr.msra.gmra.mxu0 %vm61_vm1, %v47_v9 }
   0xc   :  { %1408 = vmatprep.mubr.msk.bf16.mxu0 %vm1600_vm0, %v1599_v0 }
  0xcb   :  { %v99_v11 = vpop.f32.mrf.mxu0 }
  0xcc   :  { %v100_v12 = vadd.f32 %v1318_v10, %v99_v11 }
  0xcd   :  { %v1398_v13 = vpop.f32.mrf.mxu0 }
  0xce   :  { %v1723_v14 = vpack.c.bf16 %v100_v12, %v100_v12 }
  0xcf   :  { %v102_v15 = vpop.f32.mrf.mxu0 }
  0xd0   :  { %v103_v16 = vadd.f32 %v1318_v10, %v102_v15  ;;  %109 = vrot.lane.b32.xlu0 %v1723_v14, %s1601_s0 }
  0xd1   :  { %v1399_v17 = vpop.f32.mrf.mxu0 }
  0xd2   :  { %v1726_v18 = vpack.c.bf16 %v103_v16, %v103_v16 }
  0xd4   :  { %159 = vrot.lane.b32.xlu0 %v1726_v18, %s1601_s0 }
 0x142   :  { %v110_v19 = vpop.permute.xlu0 %109 }
 0x143   :  { %v116_v20 = vsel %vm111_vm2, %v110_v19, 0 }
 0x144   :  { %1401 = vmatpush3.bf16.xpose.msra.mxu1 %v116_v20 }
 0x145   :  { %1412 = vmatprep.subr.bf16.mxu1 %v1599_v0 }
 0x146   :  { %v160_v21 = vpop.permute.xlu0 %159 }
 0x147   :  { %v165_v22 = vsel %vm111_vm2, %v160_v21, 0 }
 0x148   :  { %1407 = vmatpush3.bf16.xpose.msra.mxu0 %v165_v22 }
 0x149   :  { %1418 = vmatprep.subr.bf16.mxu0 %v1599_v0 }
 0x14b   :  { %1403 = vmatmul.mubr.msk.bf16.vlgmr.msra.gmra.mxu1 %vm111_vm2, %v1723_v14 }
 0x14c   :  { %1414 = vmatprep.mubr.msk.bf16.mxu1 %vm1600_vm0, %v1599_v0 }
 0x14f   :  { %1409 = vmatmul.mubr.msk.bf16.vlgmr.msra.gmra.mxu0 %vm111_vm2, %v1726_v18 }
 0x150   :  { %1420 = vmatprep.mubr.msk.bf16.mxu0 %vm1600_vm0, %v1599_v0 }
 0x20b   :  { %v152_v23 = vpop.f32.mrf.mxu1 }
 0x20c   :  { %v207_v24 = vmul.f32 0.35355338, %v152_v23 }
 0x20d   :  { %v1404_v25 = vpop.f32.mrf.mxu1 }
 0x20e   :  { %v209_v26 = vsel %vm111_vm2, %v207_v24, -inf }
 0x20f   :  { %210 = vmax.xlane.f32.xlu1 %v209_v26  ;;  %v155_v27 = vpop.f32.mrf.mxu1  ;;  %v201_v28 = vpop.f32.mrf.mxu0 }
 0x210   :  { %v208_v29 = vmul.f32 0.35355338, %v201_v28 }
 0x211   :  { %v1405_v30 = vpop.f32.mrf.mxu1  ;;  %v1410_v31 = vpop.f32.mrf.mxu0 }
 0x212   :  { %v212_v32 = vsel %vm111_vm2, %v208_v29, -inf }
 0x213   :  { %213 = vmax.xlane.f32.xlu1 %v212_v32  ;;  %v204_v33 = vpop.f32.mrf.mxu0 }
 0x215   :  { %v1411_v34 = vpop.f32.mrf.mxu0 }
 0x224   :  { %233 = vrot.lane.b32.xlu1 %v1723_v14, %s1602_s2 }
 0x228   :  { %282 = vrot.lane.b32.xlu1 %v1726_v18, %s1602_s2  ;;  %s1614_s2 = smov 24  }
 0x22c   :  { %332 = vrot.lane.b32.xlu1 %v1723_v14, %s1603_s21 }
 0x298   :  { %v211_v35 = vpop.xlane.xlu1 %210 }
 0x299   :  { %v215_v36 = vsub.f32 %v207_v24, %v211_v35 }
 0x29b   :  { %v217_v37 = vmul.f32 1.442695, %v215_v36 }
 0x29c   :  { %v214_v38 = vpop.xlane.xlu1 %213 }
 0x29d   :  { %1555 = vpow2.f32 %v217_v37  ;;  %v216_v39 = vsub.f32 %v208_v29, %v214_v38 }
 0x29f   :  { %v219_v40 = vmul.f32 1.442695, %v216_v39 }
 0x2a0   :  { %v234_v41 = vpop.permute.xlu1 %233 }
 0x2a1   :  { %1557 = vpow2.f32 %v219_v40  ;;  %v240_v42 = vsel %vm238_vm3, %v234_v41, 0 }
 0x2a2   :  { %1413 = vmatpush3.bf16.msra.mxu1 %v240_v42 }
 0x2a3   :  { %1424 = vmatprep.subr.bf16.mxu1 %v1599_v0 }
 0x2a4   :  { %v283_v43 = vpop.permute.xlu1 %282 }
 0x2a5   :  { %v288_v44 = vsel %vm238_vm3, %v283_v43, 0 }
 0x2a6   :  { %1419 = vmatpush3.bf16.msra.mxu0 %v288_v44 }
 0x2a7   :  { %1430 = vmatprep.subr.bf16.mxu0 %v1599_v0 }
 0x2a8   :  { %v333_v49 = vpop.permute.xlu1 %332 }
 0x2a9   :  { %v338_v56 = vsel %vm111_vm2, %v333_v49, 0 }
 0x2aa   :  { %v1556_v45 = vpop.eup %1555 }
 0x2ab   :  { %v221_v46 = vsel %vm111_vm2, %v1556_v45, 0.0 }
 0x2ac   :  { %222 = vadd.xlane.f32.xlu0 %v221_v46 }
 0x2ae   :  { %v1558_v47 = vpop.eup %1557 }
 0x2af   :  { %v224_v48 = vsel %vm111_vm2, %v1558_v47, 0.0 }
 0x2b0   :  { %225 = vadd.xlane.f32.xlu1 %v224_v48 }
 0x2c1   :  { %382 = vrot.lane.b32.xlu1 %v1726_v18, %s1603_s21 }
 0x2c2   :  { %330 = vrot.lane.b32.xlu0 %v1723_v14, %s1604_s22 }
 0x2c5   :  { %380 = vrot.lane.b32.xlu1 %v1726_v18, %s1604_s22 }
 0x335   :  { %v223_v50 = vpop.xlane.xlu0 %222 }
 0x336   :  { %1559 = vrcp.f32 %v223_v50 }
 0x339   :  { %v226_v51 = vpop.xlane.xlu1 %225  ;;  %v331_v61 = vpop.permute.xlu0 %330 }
 0x33a   :  { %1561 = vrcp.f32 %v226_v51 }
 0x33d   :  { %v383_v58 = vpop.permute.xlu1 %382 }
 0x33e   :  { %v388_v60 = vsel %vm111_vm2, %v383_v58, 0 }
 0x341   :  { %v381_v62 = vpop.permute.xlu1 %380 }
 0x343   :  { %v1560_v52 = vpop.eup %1559 }
 0x344   :  { %v229_v53 = vmul.f32 %v1560_v52, %v1556_v45 }
 0x346   :  { %v231_v54 = vpack.c.bf16 %v229_v53, %v229_v53 }
 0x347   :  { %v1562_v55 = vpop.eup %1561 }
 0x348   :  { %1415 = vmatmul.mubr.msk.bf16.vlgmr.msra.gmra.mxu1 %vm111_vm2, %v231_v54  ;;  %v230_v57 = vmul.f32 %v1562_v55, %v1558_v47 }
 0x349   :  { %1425 = vmatpush3.bf16.xpose.msra.mxu1 %v338_v56  ;;  %1426 = vmatprep.mubr.msk.bf16.mxu1 %vm1600_vm0, %v1599_v0 }
 0x34a   :  { %v232_v59 = vpack.c.bf16 %v230_v57, %v230_v57  ;;  %1436 = vmatprep.subr.bf16.mxu1 %v1599_v0 }
 0x34c   :  { %1421 = vmatmul.mubr.msk.bf16.vlgmr.msra.gmra.mxu0 %vm111_vm2, %v232_v59 }
 0x34d   :  { %1431 = vmatpush3.bf16.xpose.msra.mxu0 %v388_v60  ;;  %1432 = vmatprep.mubr.msk.bf16.mxu0 %vm1600_vm0, %v1599_v0 }
 0x34e   :  { %1442 = vmatprep.subr.bf16.mxu0 %v1599_v0 }
 0x350   :  { %1427 = vmatmul.mubr.msk.bf16.vlgmr.msra.gmra.mxu1 %vm111_vm2, %v331_v61 }
 0x351   :  { %1438 = vmatprep.mubr.msk.bf16.mxu1 %vm1600_vm0, %v1599_v0 }
 0x354   :  { %1433 = vmatmul.mubr.msk.bf16.vlgmr.msra.gmra.mxu0 %vm111_vm2, %v381_v62 }
 0x355   :  { %1444 = vmatprep.mubr.msk.bf16.mxu0 %vm1600_vm0, %v1599_v0 }
 0x408   :  { %v1771_v63 = vpop.f32.mrf.mxu1 }
 0x40a   :  { %v1416_v1 = vpop.f32.mrf.mxu1 }
 0x40c   :  { %v279_v2 = vpop.f32.mrf.mxu1  ;;  %v1773_v3 = vpop.f32.mrf.mxu0 }
 0x40e   :  { %v1417_v4 = vpop.f32.mrf.mxu1  ;;  %v1422_v5 = vpop.f32.mrf.mxu0 }
 0x410   :  { %v327_v6 = vpop.f32.mrf.mxu0  ;;  %v374_v9 = vpop.f32.mrf.mxu1 }
 0x411   :  { %v430_v10 = vmul.f32 0.35355338, %v374_v9 }
 0x412   :  { %v1423_v11 = vpop.f32.mrf.mxu0  ;;  %v1428_v12 = vpop.f32.mrf.mxu1 }
 0x413   :  { %v432_v13 = vsel %vm111_vm2, %v430_v10, -inf }
 0x414   :  { %433 = vmax.xlane.f32.xlu1 %v432_v13  ;;  %v377_v15 = vpop.f32.mrf.mxu1  ;;  %v424_v16 = vpop.f32.mrf.mxu0 }
 0x415   :  { %v431_v17 = vmul.f32 0.35355338, %v424_v16 }
 0x416   :  { %v1429_v19 = vpop.f32.mrf.mxu1  ;;  %v1434_v20 = vpop.f32.mrf.mxu0 }
 0x417   :  { %v435_v21 = vsel %vm111_vm2, %v431_v17, -inf }
 0x418   :  { %436 = vmax.xlane.f32.xlu0 %v435_v21  ;;  %v427_v22 = vpop.f32.mrf.mxu0 }
 0x41a   :  { %v1435_v23 = vpop.f32.mrf.mxu0 }
 0x425   :  { %456 = vrot.lane.b32.xlu1 %v1723_v14, %s1605_s23 }
 0x429   :  { %554 = vrot.lane.b32.xlu1 %v1723_v14, %s1606_s24 }
 0x42e   :  { %504 = vrot.lane.b32.xlu0 %v1726_v18, %s1605_s23 }
 0x432   :  { %552 = vrot.lane.b32.xlu0 %v1723_v14, %s1607_s25 }
 0x49d   :  { %v434_v24 = vpop.xlane.xlu1 %433 }
 0x49e   :  { %v438_v25 = vsub.f32 %v430_v10, %v434_v24 }
 0x4a0   :  { %v440_v26 = vmul.f32 1.442695, %v438_v25 }
 0x4a1   :  { %v457_v27 = vpop.permute.xlu1 %456  ;;  %v437_v28 = vpop.xlane.xlu0 %436 }
 0x4a2   :  { %1563 = vpow2.f32 %v440_v26  ;;  %v462_v29 = vsel %vm238_vm3, %v457_v27, 0  ;;  %v439_v30 = vsub.f32 %v431_v17, %v437_v28 }
 0x4a3   :  { %1437 = vmatpush3.bf16.msra.mxu1 %v462_v29 }
 0x4a4   :  { %v442_v31 = vmul.f32 1.442695, %v439_v30  ;;  %1448 = vmatprep.subr.bf16.mxu1 %v1599_v0 }
 0x4a5   :  { %v505_v32 = vpop.permute.xlu0 %504  ;;  %v555_v38 = vpop.permute.xlu1 %554 }
 0x4a6   :  { %1565 = vpow2.f32 %v442_v31  ;;  %v510_v33 = vsel %vm238_vm3, %v505_v32, 0  ;;  %v560_v45 = vsel %vm111_vm2, %v555_v38, 0 }
 0x4a7   :  { %1443 = vmatpush3.bf16.msra.mxu0 %v510_v33 }
 0x4a8   :  { %1454 = vmatprep.subr.bf16.mxu0 %v1599_v0 }
 0x4a9   :  { %v553_v50 = vpop.permute.xlu0 %552 }
 0x4af   :  { %v1564_v34 = vpop.eup %1563 }
 0x4b0   :  { %v444_v35 = vsel %vm111_vm2, %v1564_v34, 0.0 }
 0x4b1   :  { %445 = vadd.xlane.f32.xlu1 %v444_v35 }
 0x4b3   :  { %v1566_v36 = vpop.eup %1565 }
 0x4b4   :  { %v447_v37 = vsel %vm111_vm2, %v1566_v36, 0.0 }
 0x4b5   :  { %448 = vadd.xlane.f32.xlu1 %v447_v37 }
 0x4c6   :  { %604 = vrot.lane.b32.xlu1 %v1726_v18, %s1606_s24 }
 0x4ca   :  { %602 = vrot.lane.b32.xlu1 %v1726_v18, %s1607_s25 }
 0x53a   :  { %v446_v39 = vpop.xlane.xlu1 %445 }
 0x53b   :  { %1567 = vrcp.f32 %v446_v39 }
 0x53e   :  { %v449_v40 = vpop.xlane.xlu1 %448 }
 0x53f   :  { %1569 = vrcp.f32 %v449_v40 }
 0x542   :  { %v605_v47 = vpop.permute.xlu1 %604 }
 0x543   :  { %v610_v49 = vsel %vm111_vm2, %v605_v47, 0 }
 0x546   :  { %v603_v51 = vpop.permute.xlu1 %602 }
 0x548   :  { %v1568_v41 = vpop.eup %1567 }
 0x549   :  { %v452_v42 = vmul.f32 %v1568_v41, %v1564_v34 }
 0x54b   :  { %v454_v43 = vpack.c.bf16 %v452_v42, %v452_v42 }
 0x54c   :  { %v1570_v44 = vpop.eup %1569 }
 0x54d   :  { %1439 = vmatmul.mubr.msk.bf16.vlgmr.msra.gmra.mxu1 %vm111_vm2, %v454_v43  ;;  %v453_v46 = vmul.f32 %v1570_v44, %v1566_v36 }
 0x54e   :  { %1449 = vmatpush3.bf16.xpose.msra.mxu1 %v560_v45  ;;  %1450 = vmatprep.mubr.msk.bf16.mxu1 %vm1600_vm0, %v1599_v0 }
 0x54f   :  { %v455_v48 = vpack.c.bf16 %v453_v46, %v453_v46  ;;  %1460 = vmatprep.subr.bf16.mxu1 %v1599_v0 }
 0x551   :  { %1445 = vmatmul.mubr.msk.bf16.vlgmr.msra.gmra.mxu0 %vm111_vm2, %v455_v48 }
 0x552   :  { %1455 = vmatpush3.bf16.xpose.msra.mxu0 %v610_v49  ;;  %1456 = vmatprep.mubr.msk.bf16.mxu0 %vm1600_vm0, %v1599_v0 }
 0x553   :  { %1466 = vmatprep.subr.bf16.mxu0 %v1599_v0 }
 0x555   :  { %1451 = vmatmul.mubr.msk.bf16.vlgmr.msra.gmra.mxu1 %vm111_vm2, %v553_v50 }
 0x556   :  { %1462 = vmatprep.mubr.msk.bf16.mxu1 %vm1600_vm0, %v1599_v0 }
 0x559   :  { %1457 = vmatmul.mubr.msk.bf16.vlgmr.msra.gmra.mxu0 %vm111_vm2, %v603_v51 }
 0x55a   :  { %1468 = vmatprep.mubr.msk.bf16.mxu0 %vm1600_vm0, %v1599_v0 }
 0x60d   :  { %v1805_v52 = vpop.f32.mrf.mxu1 }
 0x60f   :  { %v1440_v53 = vpop.f32.mrf.mxu1 }
 0x611   :  { %v501_v54 = vpop.f32.mrf.mxu1  ;;  %v1807_v55 = vpop.f32.mrf.mxu0 }
 0x612   :  { %v1540_v56 = vpack.i.bf16 %v1807_v55, %v1805_v52 }
 0x613   :  { %v1441_v57 = vpop.f32.mrf.mxu1  ;;  %v1446_v58 = vpop.f32.mrf.mxu0 }
 0x615   :  { %v549_v59 = vpop.f32.mrf.mxu0  ;;  %v596_v60 = vpop.f32.mrf.mxu1 }
 0x616   :  { %v652_v61 = vmul.f32 0.35355338, %v596_v60 }
 0x617   :  { %v1447_v62 = vpop.f32.mrf.mxu0  ;;  %v1452_v1 = vpop.f32.mrf.mxu1 }
 0x618   :  { %v654_v2 = vsel %vm111_vm2, %v652_v61, -inf }
 0x619   :  { %655 = vmax.xlane.f32.xlu0 %v654_v2  ;;  %v599_v4 = vpop.f32.mrf.mxu1  ;;  %v646_v5 = vpop.f32.mrf.mxu0 }
 0x61a   :  { %v653_v6 = vmul.f32 0.35355338, %v646_v5 }
 0x61b   :  { %v1453_v9 = vpop.f32.mrf.mxu1  ;;  %v1458_v10 = vpop.f32.mrf.mxu0 }
 0x61c   :  { %v657_v11 = vsel %vm111_vm2, %v653_v6, -inf }
 0x61d   :  { %658 = vmax.xlane.f32.xlu1 %v657_v11  ;;  %v649_v12 = vpop.f32.mrf.mxu0 }
 0x61f   :  { %v1459_v13 = vpop.f32.mrf.mxu0 }
 0x62e   :  { %678 = vrot.lane.b32.xlu1 %v1723_v14, %s1608_s26 }
 0x632   :  { %776 = vrot.lane.b32.xlu1 %v1723_v14, %s1609_s27 }
 0x636   :  { %826 = vrot.lane.b32.xlu1 %v1726_v18, %s1609_s27 }
 0x63a   :  { %824 = vrot.lane.b32.xlu1 %v1726_v18, %s1610_s28 }
 0x6a2   :  { %v656_v15 = vpop.xlane.xlu0 %655 }
 0x6a3   :  { %v660_v16 = vsub.f32 %v652_v61, %v656_v15 }
 0x6a5   :  { %v662_v17 = vmul.f32 1.442695, %v660_v16 }
 0x6a6   :  { %v659_v19 = vpop.xlane.xlu1 %658 }
 0x6a7   :  { %1571 = vpow2.f32 %v662_v17  ;;  %v661_v20 = vsub.f32 %v653_v6, %v659_v19 }
 0x6a9   :  { %v664_v21 = vmul.f32 1.442695, %v661_v20 }
 0x6aa   :  { %v679_v22 = vpop.permute.xlu1 %678 }
 0x6ab   :  { %1573 = vpow2.f32 %v664_v21  ;;  %v684_v23 = vsel %vm238_vm3, %v679_v22, 0 }
 0x6ac   :  { %1461 = vmatpush3.bf16.msra.mxu1 %v684_v23 }
 0x6ad   :  { %1472 = vmatprep.subr.bf16.mxu1 %v1599_v0 }
 0x6ae   :  { %v777_v33 = vpop.permute.xlu1 %776 }
 0x6af   :  { %v782_v37 = vsel %vm111_vm2, %v777_v33, 0 }
 0x6b2   :  { %v827_v39 = vpop.permute.xlu1 %826 }
 0x6b3   :  { %v832_v41 = vsel %vm111_vm2, %v827_v39, 0 }
 0x6b4   :  { %v1572_v24 = vpop.eup %1571 }
 0x6b5   :  { %v666_v25 = vsel %vm111_vm2, %v1572_v24, 0.0 }
 0x6b6   :  { %667 = vadd.xlane.f32.xlu0 %v666_v25  ;;  %v825_v43 = vpop.permute.xlu1 %824 }
 0x6b8   :  { %v1574_v26 = vpop.eup %1573 }
 0x6b9   :  { %v669_v27 = vsel %vm111_vm2, %v1574_v26, 0.0 }
 0x6ba   :  { %670 = vadd.xlane.f32.xlu0 %v669_v27 }
 0x6d0   :  { %726 = vrot.lane.b32.xlu0 %v1726_v18, %s1608_s26 }
 0x6d4   :  { %774 = vrot.lane.b32.xlu0 %v1723_v14, %s1610_s28 }
 0x73f   :  { %v668_v28 = vpop.xlane.xlu0 %667 }
 0x740   :  { %1575 = vrcp.f32 %v668_v28  ;;  %v1031_v28 = vld [vmem:[%s1964_s3 + $0x10] sm:$0xff] }
 0x743   :  { %v671_v29 = vpop.xlane.xlu0 %670 }
 0x744   :  { %1577 = vrcp.f32 %v671_v29  ;;  %v1032_v29 = vld [vmem:[%s1964_s3 + $0x18] sm:$0xff] }
 0x747   :  { %v727_v30 = vpop.permute.xlu0 %726 }
 0x748   :  { %v732_v31 = vsel %vm238_vm3, %v727_v30, 0  ;;  %v1034_v30 = vpack.c.bf16 %v1032_v29, %v1031_v28 }
 0x749   :  { %1467 = vmatpush3.bf16.msra.mxu0 %v732_v31  ;;  %v1029_v31 = vld [vmem:[%s1964_s3] sm:$0xff] }
 0x74a   :  { %1478 = vmatprep.subr.bf16.mxu0 %v1599_v0 }
 0x74b   :  { %v775_v42 = vpop.permute.xlu0 %774 }
 0x74d   :  { %v1576_v32 = vpop.eup %1575 }
 0x74e   :  { %v674_v34 = vmul.f32 %v1576_v32, %v1572_v24  ;;  %v1030_v32 = vld [vmem:[%s1964_s3 + $0x8] sm:$0xff] }
 0x74f   :  { %v1033_v33 = vpack.c.bf16 %v1030_v32, %v1029_v31  ;;  %v1338_v31 = vld [vmem:[%s1967_s5] ss:$0 sm:$0xff] }
 0x750   :  { %v676_v35 = vpack.c.bf16 %v674_v34, %v674_v34 }
 0x751   :  { %v1578_v36 = vpop.eup %1577 }
 0x752   :  { %1463 = vmatmul.mubr.msk.bf16.vlgmr.msra.gmra.mxu1 %vm111_vm2, %v676_v35  ;;  %v675_v38 = vmul.f32 %v1578_v36, %v1574_v26 }
 0x753   :  { %1473 = vmatpush3.bf16.xpose.msra.mxu1 %v782_v37  ;;  %1474 = vmatprep.mubr.msk.bf16.mxu1 %vm1600_vm0, %v1599_v0 }
 0x754   :  { %v677_v40 = vpack.c.bf16 %v675_v38, %v675_v38  ;;  %1484 = vmatprep.subr.bf16.mxu1 %v1599_v0 }
 0x756   :  { %1469 = vmatmul.mubr.msk.bf16.vlgmr.msra.gmra.mxu0 %vm111_vm2, %v677_v40 }
 0x757   :  { %1479 = vmatpush3.bf16.xpose.msra.mxu0 %v832_v41  ;;  %1480 = vmatprep.mubr.msk.bf16.mxu0 %vm1600_vm0, %v1599_v0 }
 0x758   :  { %1490 = vmatprep.subr.bf16.mxu0 %v1599_v0 }
 0x75a   :  { %1475 = vmatmul.mubr.msk.bf16.vlgmr.msra.gmra.mxu1 %vm111_vm2, %v775_v42 }
 0x75b   :  { %1486 = vmatprep.mubr.msk.bf16.mxu1 %vm1600_vm0, %v1599_v0 }
 0x75e   :  { %1481 = vmatmul.mubr.msk.bf16.vlgmr.msra.gmra.mxu0 %vm111_vm2, %v825_v43 }
 0x75f   :  { %1492 = vmatprep.mubr.msk.bf16.mxu0 %vm1600_vm0, %v1599_v0 }
 0x812   :  { %v720_v44 = vpop.f32.mrf.mxu1 }
 0x814   :  { %v1464_v45 = vpop.f32.mrf.mxu1 }
 0x816   :  { %v723_v46 = vpop.f32.mrf.mxu1  ;;  %v768_v47 = vpop.f32.mrf.mxu0 }
 0x817   :  { %v1545_v6 = vpack.i.bf16 %v768_v47, %v720_v44 }
 0x818   :  { %v1465_v48 = vpop.f32.mrf.mxu1  ;;  %v1470_v49 = vpop.f32.mrf.mxu0 }
 0x81a   :  { %v771_v50 = vpop.f32.mrf.mxu0  ;;  %v818_v51 = vpop.f32.mrf.mxu1 }
 0x81b   :  { %v874_v53 = vmul.f32 0.35355338, %v818_v51 }
 0x81c   :  { %v1471_v54 = vpop.f32.mrf.mxu0  ;;  %v1476_v57 = vpop.f32.mrf.mxu1 }
 0x81d   :  { %v876_v58 = vsel %vm111_vm2, %v874_v53, -inf }
 0x81e   :  { %877 = vmax.xlane.f32.xlu0 %v876_v58  ;;  %v821_v59 = vpop.f32.mrf.mxu1  ;;  %v868_v60 = vpop.f32.mrf.mxu0 }
 0x81f   :  { %v875_v61 = vmul.f32 0.35355338, %v868_v60 }
 0x820   :  { %v1477_v62 = vpop.f32.mrf.mxu1  ;;  %v1482_v1 = vpop.f32.mrf.mxu0 }
 0x821   :  { %v879_v2 = vsel %vm111_vm2, %v875_v61, -inf  ;;  %v1336_v62 = vld [vmem:[%s1965_s4] ss:$0 sm:$0xff] }
 0x822   :  { %880 = vmax.xlane.f32.xlu1 %v879_v2  ;;  %v871_v4 = vpop.f32.mrf.mxu0 }
 0x824   :  { %v1483_v5 = vpop.f32.mrf.mxu0 }
 0x833   :  { %900 = vrot.lane.b32.xlu1 %v1723_v14, %s1611_s29 }
 0x837   :  { %1541 = vrot.lane.b32.xlu1 %v1540_v56, %s1612_s30 }
 0x83b   :  { %1546 = vrot.lane.b32.xlu1 %v1545_v6, %s1613_s14 }
 0x8a7   :  { %v878_v9 = vpop.xlane.xlu0 %877 }
 0x8a8   :  { %v882_v10 = vsub.f32 %v874_v53, %v878_v9 }
 0x8aa   :  { %v884_v11 = vmul.f32 1.442695, %v882_v10 }
 0x8ab   :  { %v881_v12 = vpop.xlane.xlu1 %880 }
 0x8ac   :  { %1579 = vpow2.f32 %v884_v11  ;;  %v883_v13 = vsub.f32 %v875_v61, %v881_v12 }
 0x8ae   :  { %v886_v15 = vmul.f32 1.442695, %v883_v13 }
 0x8af   :  { %v901_v16 = vpop.permute.xlu1 %900 }
 0x8b0   :  { %1581 = vpow2.f32 %v886_v15  ;;  %v906_v17 = vsel %vm238_vm3, %v901_v16, 0 }
 0x8b1   :  { %1485 = vmatpush3.bf16.msra.mxu1 %v906_v17 }
 0x8b2   :  { %1496 = vmatprep.subr.bf16.mxu1 %v1599_v0 }
 0x8b3   :  { %v1542_v43 = vpop.permute.xlu1 %1541 }
 0x8b4   :  { %v1544_v45 = vunpack.i.h.bf16 %v1542_v43  ;;  %v1543_v46 = vunpack.i.l.bf16 %v1542_v43  ;;  %v1206_v43 = vld [vmem:[%s1969_s9 + $0x20] sm:$0xff] }
 0x8b6   :  { %v1021_v50 = vsel %vm111_vm2, %v1773_v3, %v1544_v45  ;;  %v1020_v51 = vsel %vm111_vm2, %v1771_v63, %v1543_v46  ;;  %v1204_v46 = vld [vmem:[%s1969_s9 + $0x10] sm:$0xff] }
 0x8b7   :  { %v1547_v44 = vpop.permute.xlu1 %1546 }
 0x8b8   :  { %v1549_v47 = vunpack.i.h.bf16 %v1547_v44  ;;  %v1548_v48 = vunpack.i.l.bf16 %v1547_v44  ;;  %v1207_v44 = vld [vmem:[%s1969_s9 + $0x28] sm:$0xff] }
 0x8b9   :  { %v1580_v14 = vpop.eup %1579  ;;  %v1212_v45 = vpack.c.bf16 %v1207_v44, %v1206_v43 }
 0x8ba   :  { %v888_v52 = vsel %vm111_vm2, %v1580_v14, 0.0  ;;  %v1023_v57 = vsel %vm1022_vm4, %v1020_v51, %v1548_v48  ;;  %v1024_v58 = vsel %vm1022_vm4, %v1021_v50, %v1549_v47  ;;  %v1205_v47 = vld [vmem:[%s1969_s9 + $0x18] sm:$0xff]  ;;  %v1203_v50 = vld [vmem:[%s1969_s9 + $0x8] sm:$0xff] }
 0x8bb   :  { %889 = vadd.xlane.f32.xlu0 %v888_v52  ;;  %v1211_v48 = vpack.c.bf16 %v1205_v47, %v1204_v46 }
 0x8bd   :  { %v1582_v55 = vpop.eup %1581 }
 0x8be   :  { %v891_v56 = vsel %vm111_vm2, %v1582_v55, 0.0 }
 0x8bf   :  { %892 = vadd.xlane.f32.xlu0 %v891_v56 }
 0x8d5   :  { %948 = vrot.lane.b32.xlu0 %v1726_v18, %s1611_s29 }
 0x944   :  { %v890_v19 = vpop.xlane.xlu0 %889 }
 0x945   :  { %1583 = vrcp.f32 %v890_v19  ;;  %v1137_v19 = vld [vmem:[%s1966_s7 + $0x18] sm:$0xff] }
 0x948   :  { %v893_v20 = vpop.xlane.xlu0 %892 }
 0x949   :  { %1585 = vrcp.f32 %v893_v20 }
 0x94c   :  { %v949_v21 = vpop.permute.xlu0 %948 }
 0x94d   :  { %v954_v22 = vsel %vm238_vm3, %v949_v21, 0  ;;  %v1134_v21 = vld [vmem:[%s1966_s7] sm:$0xff] }
 0x94e   :  { %1491 = vmatpush3.bf16.msra.mxu0 %v954_v22  ;;  %v1135_v22 = vld [vmem:[%s1966_s7 + $0x8] sm:$0xff] }
 0x94f   :  { %1504 = vmatprep.subr.bf16.mxu0 %v1599_v0 }
 0x952   :  { %v1584_v23 = vpop.eup %1583 }
 0x953   :  { %v896_v24 = vmul.f32 %v1584_v23, %v1580_v14  ;;  %v1138_v23 = vpack.c.bf16 %v1135_v22, %v1134_v21 }
 0x955   :  { %v898_v25 = vpack.c.bf16 %v896_v24, %v896_v24 }
 0x956   :  { %v1586_v26 = vpop.eup %1585 }
 0x957   :  { %1487 = vmatmul.mubr.msk.bf16.vlgmr.msra.gmra.mxu1 %vm111_vm2, %v898_v25  ;;  %v897_v27 = vmul.f32 %v1586_v26, %v1582_v55 }
 0x958   :  { %1500 = vmatprep.mubr.msk.bf16.mxu1 %vm1600_vm0, %v1599_v0  ;;  %1497 = vmatpush3.bf16.msra.mxu1 %v1034_v30 }
 0x959   :  { %v899_v18 = vpack.c.bf16 %v897_v27, %v897_v27  ;;  %1498 = vmatprep.subr.bf16.mxu1 %v1599_v0 }
 0x95b   :  { %1493 = vmatmul.mubr.msk.bf16.vlgmr.msra.gmra.mxu0 %vm111_vm2, %v899_v18 }
 0x95c   :  { %1508 = vmatprep.mubr.msk.bf16.mxu0 %vm1600_vm0, %v1599_v0  ;;  %1499 = vmatpush3.bf16.msra.mxu1 %v1033_v33 }
 0x95d   :  { %1512 = vmatprep.subr.bf16.mxu1 %v1599_v0 }
 0xa17   :  { %v942_v34 = vpop.f32.mrf.mxu1 }
 0xa19   :  { %v1488_v35 = vpop.f32.mrf.mxu1 }
 0xa1a   :  { %v1339_v35 = vld [vmem:[%s1968_s6] ss:$0 sm:$0xff] }
 0xa1b   :  { %v945_v36 = vpop.f32.mrf.mxu1  ;;  %v990_v37 = vpop.f32.mrf.mxu0 }
 0xa1c   :  { %v1550_v38 = vpack.i.bf16 %v990_v37, %v942_v34 }
 0xa1d   :  { %v1489_v39 = vpop.f32.mrf.mxu1  ;;  %v1494_v40 = vpop.f32.mrf.mxu0 }
 0xa1e   :  { %1551 = vrot.lane.b32.xlu0 %v1550_v38, %s1614_s2  ;;  %v1208_v40 = vld [vmem:[%s1969_s9 + $0x30] sm:$0xff] }
 0xa1f   :  { %v993_v41 = vpop.f32.mrf.mxu0 }
 0xa20   :  { %v1209_v41 = vld [vmem:[%s1969_s9 + $0x38] sm:$0xff] }
 0xa21   :  { %v1495_v42 = vpop.f32.mrf.mxu0 }
 0xa22   :  { %v1213_v42 = vpack.c.bf16 %v1209_v41, %v1208_v40 }
 0xa90   :  { %v1552_v49 = vpop.permute.xlu0 %1551 }
 0xa91   :  { %v1554_v53 = vunpack.i.h.bf16 %v1552_v49  ;;  %v1553_v54 = vunpack.i.l.bf16 %v1552_v49  ;;  %v1202_v49 = vld [vmem:[%s1969_s9] sm:$0xff] }
 0xa92   :  { %v1210_v51 = vpack.c.bf16 %v1203_v50, %v1202_v49 }
 0xa93   :  { %v1027_v59 = vsel %vm1025_vm5, %v1024_v58, %v1554_v53  ;;  %v1026_v60 = vsel %vm1025_vm5, %v1023_v57, %v1553_v54  ;;  %v1340_v53 = vld [vmem:[%s1970_s8] ss:$0 sm:$0xff] }
 0xa94   :  { %v1028_v61 = vpack.c.bf16 %v1027_v59, %v1026_v60 }
 0xa96   :  { %1501 = vmatmul.mubr.msk.bf16.vlgmr.msra.gmra.mxu1 %vm61_vm1, %v1028_v61 }
 0xa97   :  { %1520 = vmatprep.mubr.msk.bf16.mxu1 %vm1600_vm0, %v1599_v0  ;;  %1513 = vmatpush3.bf16.msra.mxu1 %v1213_v42 }
 0xa98   :  { %1514 = vmatprep.subr.bf16.mxu1 %v1599_v0 }
 0xa9b   :  { %1515 = vmatpush3.bf16.msra.mxu1 %v1212_v45 }
 0xa9c   :  { %1516 = vmatprep.subr.bf16.mxu1 %v1599_v0 }
 0xa9f   :  { %1517 = vmatpush3.bf16.msra.mxu1 %v1211_v48 }
 0xaa0   :  { %1518 = vmatprep.subr.bf16.mxu1 %v1599_v0 }
 0xaa3   :  { %1519 = vmatpush3.bf16.msra.mxu1 %v1210_v51 }
 0xb56   :  { %v1079_v3 = vpop.f32.mrf.mxu1 }
 0xb57   :  { %v1080_v1 = vadd.f32 %v1336_v62, %v1079_v3 }
 0xb58   :  { %v1502_v2 = vpop.f32.mrf.mxu1 }
 0xb59   :  { %v1086_v63 = vadd.f32 %v1080_v1, %v1706_v7 }
 0xb5a   :  { %v1082_v4 = vpop.f32.mrf.mxu1 }
 0xb5b   :  { %v1083_v5 = vadd.f32 %v1336_v62, %v1082_v4  ;;  %v1090_v6 = vsel %vm61_vm1, %v1086_v63, 0.0 }
 0xb5c   :  { %1091 = vadd.xlane.f32.xlu1 %v1090_v6  ;;  %v1503_v9 = vpop.f32.mrf.mxu1 }
 0xb5d   :  { %v1087_v10 = vadd.f32 %v1083_v5, %v1711_v8  ;;  %v1136_v8 = vld [vmem:[%s1966_s7 + $0x10] sm:$0xff] }
 0xb5e   :  { %v1139_v20 = vpack.c.bf16 %v1137_v19, %v1136_v8 }
 0xb5f   :  { %v1093_v11 = vsel %vm61_vm1, %v1087_v10, 0.0 }
 0xb60   :  { %1094 = vadd.xlane.f32.xlu0 %v1093_v11  ;;  %1505 = vmatpush3.bf16.msra.mxu0 %v1139_v20  ;;  %v1342_v11 = vld [vmem:[%s1971_s10] ss:$0 sm:$0xff] }
 0xb61   :  { %1506 = vmatprep.subr.bf16.mxu0 %v1599_v0 }
 0xb64   :  { %1507 = vmatpush3.bf16.msra.mxu0 %v1138_v23 }
 0xbe5   :  { %v1092_v12 = vpop.xlane.xlu1 %1091 }
 0xbe6   :  { %v1097_v13 = vmul.f32 0.03125, %v1092_v12 }
 0xbe8   :  { %v1099_v15 = vsub.f32 %v1086_v63, %v1097_v13 }
 0xbe9   :  { %v1095_v16 = vpop.xlane.xlu0 %1094 }
 0xbea   :  { %v1098_v17 = vmul.f32 0.03125, %v1095_v16  ;;  %v1101_v14 = vmul.f32 %v1099_v15, %v1099_v15 }
 0xbec   :  { %v1100_v52 = vsub.f32 %v1087_v10, %v1098_v17  ;;  %v1103_v7 = vsel %vm61_vm1, %v1101_v14, 0.0 }
 0xbed   :  { %1104 = vadd.xlane.f32.xlu0 %v1103_v7 }
 0xbee   :  { %v1102_v55 = vmul.f32 %v1100_v52, %v1100_v52 }
 0xbf0   :  { %v1106_v56 = vsel %vm61_vm1, %v1102_v55, 0.0 }
 0xbf1   :  { %1107 = vadd.xlane.f32.xlu1 %v1106_v56 }
 0xc76   :  { %v1105_v24 = vpop.xlane.xlu0 %1104 }
 0xc77   :  { %v1109_v25 = vmul.f32 0.03125, %v1105_v24 }
 0xc79   :  { %v1111_v26 = vadd.f32 1e-12, %v1109_v25 }
 0xc7a   :  { %v1108_v27 = vpop.xlane.xlu1 %1107 }
 0xc7b   :  { %1587 = vrsqrt.f32 %v1111_v26  ;;  %v1110_v18 = vmul.f32 0.03125, %v1108_v27 }
 0xc7d   :  { %v1112_v28 = vadd.f32 1e-12, %v1110_v18 }
 0xc7f   :  { %1589 = vrsqrt.f32 %v1112_v28 }
 0xc88   :  { %v1588_v29 = vpop.eup %1587 }
 0xc89   :  { %v1115_v30 = vmul.f32 %v1588_v29, %v1099_v15 }
 0xc8b   :  { %v1123_v34 = vmul.f32 %v1338_v31, %v1115_v30 }
 0xc8c   :  { %v1590_v32 = vpop.eup %1589 }
 0xc8d   :  { %v1116_v33 = vmul.f32 %v1590_v32, %v1100_v52  ;;  %v1131_v37 = vadd.f32 %v1339_v35, %v1123_v34  ;;  %v1344_v34 = vld [vmem:[%s1972_s11] ss:$0 sm:$0xff] }
 0xc8f   :  { %v1124_v36 = vmul.f32 %v1338_v31, %v1116_v33 }
 0xc91   :  { %v1132_v38 = vadd.f32 %v1339_v35, %v1124_v36  ;;  %v1345_v36 = vld [vmem:[%s1973_s12] ss:$0 sm:$0xff] }
 0xc93   :  { %v1133_v39 = vpack.c.bf16 %v1132_v38, %v1131_v37 }
 0xc95   :  { %1509 = vmatmul.mubr.msk.bf16.vlgmr.msra.gmra.mxu0 %vm61_vm1, %v1133_v39 }
 0xd55   :  { %v1184_v54 = vpop.f32.mrf.mxu0 }
 0xd56   :  { %v1185_v57 = vadd.f32 %v1340_v53, %v1184_v54 }
 0xd57   :  { %v1510_v58 = vpop.f32.mrf.mxu0 }
 0xd58   :  { %v1193_v59 = vmul.f32 0.70710677, %v1185_v57  ;;  %v1191_v63 = vmul.f32 0.5, %v1185_v57 }
 0xd59   :  { %v1187_v60 = vpop.f32.mrf.mxu0 }
 0xd5a   :  { %1591 = verf.f32 %v1193_v59  ;;  %v1188_v0 = vadd.f32 %v1340_v53, %v1187_v60 }
 0xd5b   :  { %v1511_v61 = vpop.f32.mrf.mxu0 }
 0xd5c   :  { %v1194_v62 = vmul.f32 0.70710677, %v1188_v0  ;;  %v1192_v4 = vmul.f32 0.5, %v1188_v0 }
 0xd5e   :  { %1593 = verf.f32 %v1194_v62 }
 0xd67   :  { %v1592_v3 = vpop.eup %1591 }
 0xd68   :  { %v1197_v1 = vadd.f32 1.0, %v1592_v3 }
 0xd6a   :  { %v1199_v6 = vmul.f32 %v1197_v1, %v1191_v63 }
 0xd6b   :  { %v1594_v2 = vpop.eup %1593 }
 0xd6c   :  { %v1198_v5 = vadd.f32 1.0, %v1594_v2 }
 0xd6e   :  { %v1200_v9 = vmul.f32 %v1198_v5, %v1192_v4 }
 0xd70   :  { %v1201_v10 = vpack.c.bf16 %v1200_v9, %v1199_v6 }
 0xd72   :  { %1521 = vmatmul.mubr.msk.bf16.vlgmr.msra.gmra.mxu1 %vm1221_vm6, %v1201_v10 }
 0xe32   :  { %v1259_v12 = vpop.f32.mrf.mxu1 }
 0xe33   :  { %v1260_v13 = vadd.f32 %v1342_v11, %v1259_v12 }
 0xe34   :  { %v1522_v15 = vpop.f32.mrf.mxu1 }
 0xe35   :  { %v1266_v16 = vadd.f32 %v1260_v13, %v1131_v37 }
 0xe36   :  { %v1262_v17 = vpop.f32.mrf.mxu1 }
 0xe37   :  { %v1263_v14 = vadd.f32 %v1342_v11, %v1262_v17  ;;  %v1270_v52 = vsel %vm61_vm1, %v1266_v16, 0.0 }
 0xe38   :  { %1271 = vadd.xlane.f32.xlu0 %v1270_v52  ;;  %v1523_v7 = vpop.f32.mrf.mxu1 }
 0xe39   :  { %v1267_v55 = vadd.f32 %v1263_v14, %v1132_v38 }
 0xe3b   :  { %v1273_v56 = vsel %vm61_vm1, %v1267_v55, 0.0 }
 0xe3c   :  { %1274 = vadd.xlane.f32.xlu1 %v1273_v56 }
 0xec1   :  { %v1272_v8 = vpop.xlane.xlu0 %1271 }
 0xec2   :  { %v1276_v19 = vmul.f32 0.03125, %v1272_v8 }
 0xec4   :  { %v1278_v20 = vsub.f32 %v1266_v16, %v1276_v19 }
 0xec5   :  { %v1275_v21 = vpop.xlane.xlu1 %1274 }
 0xec6   :  { %v1277_v22 = vmul.f32 0.03125, %v1275_v21  ;;  %v1280_v23 = vmul.f32 %v1278_v20, %v1278_v20 }
 0xec8   :  { %v1279_v24 = vsub.f32 %v1267_v55, %v1277_v22  ;;  %v1282_v25 = vsel %vm61_vm1, %v1280_v23, 0.0 }
 0xec9   :  { %1283 = vadd.xlane.f32.xlu0 %v1282_v25 }
 0xeca   :  { %v1281_v26 = vmul.f32 %v1279_v24, %v1279_v24 }
 0xecc   :  { %v1285_v27 = vsel %vm61_vm1, %v1281_v26, 0.0 }
 0xecd   :  { %1286 = vadd.xlane.f32.xlu1 %v1285_v27 }
 0xf52   :  { %v1284_v18 = vpop.xlane.xlu0 %1283 }
 0xf53   :  { %v1288_v28 = vmul.f32 0.03125, %v1284_v18 }
 0xf55   :  { %v1290_v29 = vadd.f32 1e-12, %v1288_v28 }
 0xf56   :  { %v1287_v30 = vpop.xlane.xlu1 %1286 }
 0xf57   :  { %1595 = vrsqrt.f32 %v1290_v29  ;;  %v1289_v31 = vmul.f32 0.03125, %v1287_v30 }
 0xf59   :  { %v1291_v32 = vadd.f32 1e-12, %v1289_v31 }
 0xf5b   :  { %1597 = vrsqrt.f32 %v1291_v32 }
 0xf64   :  { %v1596_v33 = vpop.eup %1595 }
 0xf65   :  { %v1294_v35 = vmul.f32 %v1596_v33, %v1278_v20 }
 0xf67   :  { %v1302_v37 = vmul.f32 %v1344_v34, %v1294_v35 }
 0xf68   :  { %v1598_v38 = vpop.eup %1597 }
 0xf69   :  { %v1310_v39 = vadd.f32 %v1345_v36, %v1302_v37  ;;  %v1295_v40 = vmul.f32 %v1598_v38, %v1279_v24 }
 0xf6b   :  { %1312 = vst.msk [vmem:[%s1974_s13] sm:$0xff] %vm61_vm1, %v1310_v39  ;;  %v1303_v41 = vmul.f32 %v1344_v34, %v1295_v40 }
 0xf6d   :  { %v1311_v42 = vadd.f32 %v1345_v36, %v1303_v41 }
 0xf6f   :  { %1313 = vst.msk [vmem:[%s1974_s13 + $0x8] sm:$0xff] %vm61_vm1, %v1311_v42 }

</bundles_post_ra>
